<compile_context>
chip_gen: v7x
topology: tpu7x:2x2x1
jax: 0.10.0
libtpu: 0.0.40
codegen_flags: <defaults>
</compile_context>

<pallas_src>
import jax
import jax.numpy as jnp
from jax import lax
from jax.experimental import pallas as pl
from jax.experimental.pallas import tpu as pltpu

N_EMBD = 32
N_HEAD_ARG = 4                       # Block(n_embd=32, n_head=4)
NUM_HEADS = N_EMBD // N_HEAD_ARG     # 8 (because of the swapped-arg quirk)
HEAD_SIZE = N_HEAD_ARG               # 4
HIDDEN = 4 * N_EMBD                  # 128
LN_EPS = 1e-5
SCALE = float(N_EMBD) ** -0.5        # wei = q @ k.T * C**-0.5 with C = n_embd
COMPUTE_DTYPE = jnp.bfloat16         # MXU operand dtype (accumulation stays f32)
NEG_INF = -1e30                      # large finite mask value (NaN-safe if rows are padded)


def _layernorm(x, g, b):
    mu = jnp.mean(x, axis=-1, keepdims=True)
    var = jnp.mean(jnp.square(x - mu), axis=-1, keepdims=True)
    return (x - mu) * lax.rsqrt(var + LN_EPS) * g + b


def block_kernel(x_ref, ln1g_ref, ln1b_ref, wqkv_ref, wp_ref, bp_ref,
                 ln2g_ref, ln2b_ref, w1_ref, b1_ref, w2_ref, b2_ref,
                 o_ref, att_sc):
    BB, T, C = x_ref.shape
    rows = BB * T
    D = HEAD_SIZE

    x = x_ref[...].reshape(rows, C)                          # (rows, C) f32

    # ---- LayerNorm 1 (f32 statistics) ----
    xln = _layernorm(x, ln1g_ref[...], ln1b_ref[...])

    # ---- fused QKV projection: one lane-dense MXU matmul (scale folded into Wq) ----
    qkv = jnp.dot(xln.astype(COMPUTE_DTYPE), wqkv_ref[...],
                  preferred_element_type=jnp.float32)        # (rows, 3C) f32

    # ---- shared causal mask ----
    r_i = lax.broadcasted_iota(jnp.int32, (T, T), 0)
    c_i = lax.broadcasted_iota(jnp.int32, (T, T), 1)
    causal = c_i <= r_i

    # ---- per-(sequence, head) attention.  head_size=4 keeps these dots tiny no
    #      matter what; each head's p@v lands directly in its lane slice of the
    #      scratch, so there is no concatenate and a single projection matmul. ----
    for b in range(BB):
        r0 = b * T
        for h in range(NUM_HEADS):
            q = qkv[r0:r0 + T, h * D:(h + 1) * D]                    # already * SCALE
            k = qkv[r0:r0 + T, C + h * D:C + (h + 1) * D]
            v = qkv[r0:r0 + T, 2 * C + h * D:2 * C + (h + 1) * D]
            s = jnp.einsum('td,sd->ts', q, k,
                           preferred_element_type=jnp.float32)       # (T, T)
            s = jnp.where(causal, s, NEG_INF)
            e = jnp.exp(s - jnp.max(s, axis=-1, keepdims=True))
            p = e * pl.reciprocal(jnp.sum(e, axis=-1, keepdims=True), approx=True)
            # TODO(synk): nn.Dropout treated as identity (inference/eval semantics).
            att_sc[r0:r0 + T, h * D:(h + 1) * D] = jnp.dot(
                p, v, preferred_element_type=jnp.float32)

    # ---- output projection: one (rows, C) x (C, C) matmul ----
    att = jnp.dot(att_sc[...].astype(COMPUTE_DTYPE), wp_ref[...],
                  preferred_element_type=jnp.float32) + bp_ref[...]
    x1 = x + att                                             # residual 1 (f32)

    # ---- LayerNorm 2 + FeedForward (Linear -> ReLU -> Linear) ----
    x2 = _layernorm(x1, ln2g_ref[...], ln2b_ref[...])
    h1 = jnp.maximum(
        jnp.dot(x2.astype(COMPUTE_DTYPE), w1_ref[...],
                preferred_element_type=jnp.float32) + b1_ref[...], 0.0)
    ff = jnp.dot(h1.astype(COMPUTE_DTYPE), w2_ref[...],
                 preferred_element_type=jnp.float32) + b2_ref[...]

    o_ref[...] = (x1 + ff).reshape(BB, T, C).astype(o_ref.dtype)     # residual 2


def _fuse_head_weights(w):
    # (H, C, D) per-head weights -> (C, H*D) column blocks, head-major (matches torch.cat).
    return jnp.transpose(w, (1, 0, 2)).reshape(N_EMBD, NUM_HEADS * HEAD_SIZE)


def prepare_params(params):
    """Fold per-head Q/K/V weights into one (C, 3C) matrix (scale folded into Q)
    and cast the MXU weight operands to bf16. LN params / biases stay f32."""
    (ln1g, ln1b, wq, wk, wv, wp, bp, ln2g, ln2b, w1, b1, w2, b2) = params
    wqkv = jnp.concatenate(
        [_fuse_head_weights(wq) * SCALE,
         _fuse_head_weights(wk),
         _fuse_head_weights(wv)], axis=1)                    # (C, 3C)
    cd = COMPUTE_DTYPE
    return (ln1g, ln1b, wqkv.astype(cd), wp.astype(cd), bp,
            ln2g, ln2b, w1.astype(cd), b1, w2.astype(cd), b2)


def _batch_block(B):
    # biggest uniform batch block that still leaves >= 2 grid steps (v7x has 2 TCs).
    if B <= 2:
        return 1
    bb = B // 2
    while B % bb:
        bb -= 1
    return max(bb, 1)


def block_forward(x, params):
    B, T, C = x.shape
    assert C == N_EMBD
    prep = prepare_params(params)    # in a real model: fold once and reuse across calls
    BB = _batch_block(B)
    grid = (B // BB,)

    def full(arr):
        nd = arr.ndim
        return pl.BlockSpec(arr.shape, lambda i, _nd=nd: (0,) * _nd)

    in_specs = [pl.BlockSpec((BB, T, C), lambda i: (i, 0, 0))] + [full(p) for p in prep]

    return pl.pallas_call(
        block_kernel,
        out_shape=jax.ShapeDtypeStruct((B, T, C), x.dtype),
        grid=grid,
        in_specs=in_specs,
        out_specs=pl.BlockSpec((BB, T, C), lambda i: (i, 0, 0)),
        scratch_shapes=[pltpu.VMEM((BB * T, C), jnp.float32)],
        compiler_params=pltpu.CompilerParams(dimension_semantics=("parallel",)),
    )(x, *prep)


def init_params(key):
    ks = jax.random.split(key, 10)
    inv = lambda n: 1.0 / jnp.sqrt(jnp.float32(n))
    wq = jax.random.normal(ks[0], (NUM_HEADS, N_EMBD, HEAD_SIZE), jnp.float32) * inv(N_EMBD)
    wk = jax.random.normal(ks[1], (NUM_HEADS, N_EMBD, HEAD_SIZE), jnp.float32) * inv(N_EMBD)
    wv = jax.random.normal(ks[2], (NUM_HEADS, N_EMBD, HEAD_SIZE), jnp.float32) * inv(N_EMBD)
    wp = jax.random.normal(ks[3], (N_EMBD, N_EMBD), jnp.float32) * inv(N_EMBD)
    bp = jax.random.normal(ks[4], (1, N_EMBD), jnp.float32) * 0.01
    w1 = jax.random.normal(ks[5], (N_EMBD, HIDDEN), jnp.float32) * inv(N_EMBD)
    b1 = jax.random.normal(ks[6], (1, HIDDEN), jnp.float32) * 0.01
    w2 = jax.random.normal(ks[7], (HIDDEN, N_EMBD), jnp.float32) * inv(HIDDEN)
    b2 = jax.random.normal(ks[8], (1, N_EMBD), jnp.float32) * 0.01
    ln1g = jnp.ones((1, N_EMBD), jnp.float32)
    ln1b = jnp.zeros((1, N_EMBD), jnp.float32)
    ln2g = jnp.ones((1, N_EMBD), jnp.float32)
    ln2b = jnp.zeros((1, N_EMBD), jnp.float32)
    return (ln1g, ln1b, wq, wk, wv, wp, bp, ln2g, ln2b, w1, b1, w2, b2)


def block_reference(x, params):
    """Pure-f32 JAX reference matching the PyTorch module semantics."""
    (ln1g, ln1b, wq, wk, wv, wp, bp, ln2g, ln2b, w1, b1, w2, b2) = params

    def ln(y, g, b):
        mu = y.mean(-1, keepdims=True)
        var = ((y - mu) ** 2).mean(-1, keepdims=True)
        return (y - mu) / jnp.sqrt(var + LN_EPS) * g + b

    B, T, C = x.shape
    xln = ln(x, ln1g, ln1b)
    q = jnp.einsum('btc,hcd->bhtd', xln, wq)
    k = jnp.einsum('btc,hcd->bhtd', xln, wk)
    v = jnp.einsum('btc,hcd->bhtd', xln, wv)
    wei = jnp.einsum('bhtd,bhsd->bhts', q, k) * SCALE
    mask = jnp.tril(jnp.ones((T, T), bool))
    wei = jnp.where(mask, wei, -jnp.inf)
    p = jax.nn.softmax(wei, axis=-1)
    att = jnp.einsum('bhts,bhsd->bthd', p, v).reshape(B, T, C)
    x1 = x + att @ wp + bp
    x2 = ln(x1, ln2g, ln2b)
    ff = jnp.maximum(x2 @ w1 + b1, 0.0) @ w2 + b2
    return x1 + ff


if __name__ == "__main__":
    key = jax.random.PRNGKey(0)
    kx, kp = jax.random.split(key)
    params = init_params(kp)

    # (B=2, T=8): the canonical small shape (grid of 2 parallel steps, one seq each).
    # (B=8, T=8): exercises the multi-sequence-per-grid-step path (BB=4, 2 steps).
    for B, T in ((2, 8), (8, 8)):
        x = jax.random.normal(jax.random.fold_in(kx, B), (B, T, N_EMBD), jnp.float32)
        out = jax.block_until_ready(block_forward(x, params))
        ref = jax.block_until_ready(block_reference(x, params))
        assert out.shape == (B, T, N_EMBD)
        max_err = float(jnp.max(jnp.abs(out - ref)))
        # bf16 MXU operands (per perf guidance) vs. the pure-f32 reference:
        # expected deviation ~1e-2..3e-2; LN/softmax statistics are kept in f32.
        assert max_err < 1e-1, f"mismatch vs reference (B={B}): {max_err}"
    print("KERNEL_OK")
</pallas_src>

<mosaic_0001>
module attributes {stable_mosaic.version = 11 : i64} {
  func.func @block_kernel(%arg0: i32, %arg1: memref<1x8x32xf32, #tpu.memory_space<vmem>>, %arg2: memref<1x32xf32, #tpu.memory_space<vmem>>, %arg3: memref<1x32xf32, #tpu.memory_space<vmem>>, %arg4: memref<32x96xbf16, #tpu.memory_space<vmem>>, %arg5: memref<32x32xbf16, #tpu.memory_space<vmem>>, %arg6: memref<1x32xf32, #tpu.memory_space<vmem>>, %arg7: memref<1x32xf32, #tpu.memory_space<vmem>>, %arg8: memref<1x32xf32, #tpu.memory_space<vmem>>, %arg9: memref<32x128xbf16, #tpu.memory_space<vmem>>, %arg10: memref<1x128xf32, #tpu.memory_space<vmem>>, %arg11: memref<128x32xbf16, #tpu.memory_space<vmem>>, %arg12: memref<1x32xf32, #tpu.memory_space<vmem>>, %arg13: memref<1x8x32xf32, #tpu.memory_space<vmem>>, %arg14: memref<8x32xf32, #tpu.memory_space<vmem>>) attributes {dimension_semantics = [#tpu.dimension_semantics<parallel>], iteration_bounds = array<i64: 2>, scalar_prefetch = 0 : i64, scratch_operands = 1 : i64, tpu.core_type = #tpu.core_type<tc>, window_params = [{transform_indices = @transform_0, window_bounds = array<i64: 1, 8, 32>}, {pipeline_mode = #tpu.pipeline_mode<synchronous>, transform_indices = @transform_1, window_bounds = array<i64: 1, 32>}, {pipeline_mode = #tpu.pipeline_mode<synchronous>, transform_indices = @transform_2, window_bounds = array<i64: 1, 32>}, {pipeline_mode = #tpu.pipeline_mode<synchronous>, transform_indices = @transform_3, window_bounds = array<i64: 32, 96>}, {pipeline_mode = #tpu.pipeline_mode<synchronous>, transform_indices = @transform_4, window_bounds = array<i64: 32, 32>}, {pipeline_mode = #tpu.pipeline_mode<synchronous>, transform_indices = @transform_5, window_bounds = array<i64: 1, 32>}, {pipeline_mode = #tpu.pipeline_mode<synchronous>, transform_indices = @transform_6, window_bounds = array<i64: 1, 32>}, {pipeline_mode = #tpu.pipeline_mode<synchronous>, transform_indices = @transform_7, window_bounds = array<i64: 1, 32>}, {pipeline_mode = #tpu.pipeline_mode<synchronous>, transform_indices = @transform_8, window_bounds = array<i64: 32, 128>}, {pipeline_mode = #tpu.pipeline_mode<synchronous>, transform_indices = @transform_9, window_bounds = array<i64: 1, 128>}, {pipeline_mode = #tpu.pipeline_mode<synchronous>, transform_indices = @transform_10, window_bounds = array<i64: 128, 32>}, {pipeline_mode = #tpu.pipeline_mode<synchronous>, transform_indices = @transform_11, window_bounds = array<i64: 1, 32>}, {transform_indices = @transform_12, window_bounds = array<i64: 1, 8, 32>}]} {
    %c0 = arith.constant 0 : index
    %c0_0 = arith.constant 0 : index
    %c0_1 = arith.constant 0 : index
    %0 = vector.load %arg1[%c0, %c0_0, %c0_1] : memref<1x8x32xf32, #tpu.memory_space<vmem>>, vector<1x8x32xf32>
    %1 = vector.shape_cast %0 : vector<1x8x32xf32> to vector<8x32xf32>
    %c0_2 = arith.constant 0 : index
    %c0_3 = arith.constant 0 : index
    %2 = vector.load %arg2[%c0_2, %c0_3] : memref<1x32xf32, #tpu.memory_space<vmem>>, vector<1x32xf32>
    %c0_4 = arith.constant 0 : index
    %c0_5 = arith.constant 0 : index
    %3 = vector.load %arg3[%c0_4, %c0_5] : memref<1x32xf32, #tpu.memory_space<vmem>>, vector<1x32xf32>
    %cst = arith.constant dense<0.000000e+00> : vector<8xf32>
    %4 = vector.multi_reduction <add>, %1, %cst [1] : vector<8x32xf32> to vector<8xf32>
    %5 = vector.shape_cast %4 : vector<8xf32> to vector<8x1xf32>
    %cst_6 = arith.constant 3.200000e+01 : f32
    %6 = vector.broadcast %cst_6 : f32 to vector<8x1xf32>
    %7 = arith.divf %5, %6 : vector<8x1xf32>
    %8 = vector.broadcast %7 : vector<8x1xf32> to vector<8x32xf32>
    %9 = arith.subf %1, %8 : vector<8x32xf32>
    %10 = arith.mulf %9, %9 : vector<8x32xf32>
    %cst_7 = arith.constant dense<0.000000e+00> : vector<8xf32>
    %11 = vector.multi_reduction <add>, %10, %cst_7 [1] : vector<8x32xf32> to vector<8xf32>
    %12 = vector.shape_cast %11 : vector<8xf32> to vector<8x1xf32>
    %cst_8 = arith.constant 3.200000e+01 : f32
    %13 = vector.broadcast %cst_8 : f32 to vector<8x1xf32>
    %14 = arith.divf %12, %13 : vector<8x1xf32>
    %15 = vector.broadcast %7 : vector<8x1xf32> to vector<8x32xf32>
    %16 = arith.subf %1, %15 : vector<8x32xf32>
    %cst_9 = arith.constant 9.99999974E-6 : f32
    %17 = vector.broadcast %cst_9 : f32 to vector<8x1xf32>
    %18 = arith.addf %14, %17 : vector<8x1xf32>
    %19 = math.rsqrt %18 : vector<8x1xf32>
    %20 = vector.broadcast %19 : vector<8x1xf32> to vector<8x32xf32>
    %21 = arith.mulf %16, %20 : vector<8x32xf32>
    %22 = vector.broadcast %2 : vector<1x32xf32> to vector<8x32xf32>
    %23 = arith.mulf %21, %22 : vector<8x32xf32>
    %24 = vector.broadcast %3 : vector<1x32xf32> to vector<8x32xf32>
    %25 = arith.addf %23, %24 : vector<8x32xf32>
    %26 = arith.truncf %25 : vector<8x32xf32> to vector<8x32xbf16>
    %c0_10 = arith.constant 0 : index
    %c0_11 = arith.constant 0 : index
    %27 = vector.load %arg4[%c0_10, %c0_11] : memref<32x96xbf16, #tpu.memory_space<vmem>>, vector<32x96xbf16>
    %cst_12 = arith.constant dense<0.000000e+00> : vector<8x96xf32>
    %28 = tpu.matmul %26, %27, %cst_12 {dimension_numbers = #tpu.dot_dimension_numbers<[1], [0], [0], [1], [0, 0, 1, 1], [], []>} : vector<8x32xbf16>, vector<32x96xbf16>, vector<8x96xf32> -> vector<8x96xf32>
    %29 = tpu.iota {dimensions = array<i32: 0>} : vector<8x8xi32>
    %30 = tpu.iota {dimensions = array<i32: 1>} : vector<8x8xi32>
    %31 = arith.cmpi sle, %30, %29 : vector<8x8xi32>
    %32 = vector.extract_strided_slice %28 {offsets = [0, 0], sizes = [8, 4], strides = [1, 1]} : vector<8x96xf32> to vector<8x4xf32>
    %33 = vector.extract_strided_slice %28 {offsets = [0, 32], sizes = [8, 4], strides = [1, 1]} : vector<8x96xf32> to vector<8x4xf32>
    %34 = vector.extract_strided_slice %28 {offsets = [0, 64], sizes = [8, 4], strides = [1, 1]} : vector<8x96xf32> to vector<8x4xf32>
    "tpu.trace_start"() <{level = 10 : i32, message = "td,sd->ts"}> : () -> ()
    %cst_13 = arith.constant dense<0.000000e+00> : vector<8x8xf32>
    %35 = tpu.matmul %32, %33, %cst_13 {dimension_numbers = #tpu.dot_dimension_numbers<[1], [1], [0], [0], [0, 0, 1, 0], [], []>} : vector<8x4xf32>, vector<8x4xf32>, vector<8x8xf32> -> vector<8x8xf32>
    %cst_14 = arith.constant -1.000000e+30 : f32
    "tpu.trace_stop"() : () -> ()
    %36 = vector.broadcast %cst_14 : f32 to vector<8x8xf32>
    %37 = arith.select %31, %35, %36 : vector<8x8xi1>, vector<8x8xf32>
    %cst_15 = arith.constant dense<0xFF800000> : vector<8xf32>
    %38 = vector.multi_reduction <maximumf>, %37, %cst_15 [1] : vector<8x8xf32> to vector<8xf32>
    %39 = vector.shape_cast %38 : vector<8xf32> to vector<8x1xf32>
    %40 = vector.broadcast %39 : vector<8x1xf32> to vector<8x8xf32>
    %41 = arith.subf %37, %40 : vector<8x8xf32>
    %42 = math.exp %41 : vector<8x8xf32>
    %cst_16 = arith.constant dense<0.000000e+00> : vector<8xf32>
    %43 = vector.multi_reduction <add>, %42, %cst_16 [1] : vector<8x8xf32> to vector<8xf32>
    %44 = vector.shape_cast %43 : vector<8xf32> to vector<8x1xf32>
    %45 = tpu.reciprocal %44 {approx = true} : vector<8x1xf32> -> vector<8x1xf32>
    %46 = vector.broadcast %45 : vector<8x1xf32> to vector<8x8xf32>
    %47 = arith.mulf %42, %46 : vector<8x8xf32>
    %cst_17 = arith.constant dense<0.000000e+00> : vector<8x4xf32>
    %48 = tpu.matmul %47, %34, %cst_17 {dimension_numbers = #tpu.dot_dimension_numbers<[1], [0], [0], [1], [0, 0, 1, 1], [], []>} : vector<8x8xf32>, vector<8x4xf32>, vector<8x4xf32> -> vector<8x4xf32>
    %c0_18 = arith.constant 0 : index
    %c0_19 = arith.constant 0 : index
    %49 = vector.load %arg14[%c0_18, %c0_19] : memref<8x32xf32, #tpu.memory_space<vmem>>, vector<8x4xf32>
    tpu.vector_store %arg14[%c0_18, %c0_19], %48 {strides = array<i32>} : memref<8x32xf32, #tpu.memory_space<vmem>>, vector<8x4xf32>,
    %50 = vector.extract_strided_slice %28 {offsets = [0, 4], sizes = [8, 4], strides = [1, 1]} : vector<8x96xf32> to vector<8x4xf32>
    %51 = vector.extract_strided_slice %28 {offsets = [0, 36], sizes = [8, 4], strides = [1, 1]} : vector<8x96xf32> to vector<8x4xf32>
    %52 = vector.extract_strided_slice %28 {offsets = [0, 68], sizes = [8, 4], strides = [1, 1]} : vector<8x96xf32> to vector<8x4xf32>
    "tpu.trace_start"() <{level = 10 : i32, message = "td,sd->ts"}> : () -> ()
    %cst_20 = arith.constant dense<0.000000e+00> : vector<8x8xf32>
    %53 = tpu.matmul %50, %51, %cst_20 {dimension_numbers = #tpu.dot_dimension_numbers<[1], [1], [0], [0], [0, 0, 1, 0], [], []>} : vector<8x4xf32>, vector<8x4xf32>, vector<8x8xf32> -> vector<8x8xf32>
    %cst_21 = arith.constant -1.000000e+30 : f32
    "tpu.trace_stop"() : () -> ()
    %54 = vector.broadcast %cst_21 : f32 to vector<8x8xf32>
    %55 = arith.select %31, %53, %54 : vector<8x8xi1>, vector<8x8xf32>
    %cst_22 = arith.constant dense<0xFF800000> : vector<8xf32>
    %56 = vector.multi_reduction <maximumf>, %55, %cst_22 [1] : vector<8x8xf32> to vector<8xf32>
    %57 = vector.shape_cast %56 : vector<8xf32> to vector<8x1xf32>
    %58 = vector.broadcast %57 : vector<8x1xf32> to vector<8x8xf32>
    %59 = arith.subf %55, %58 : vector<8x8xf32>
    %60 = math.exp %59 : vector<8x8xf32>
    %cst_23 = arith.constant dense<0.000000e+00> : vector<8xf32>
    %61 = vector.multi_reduction <add>, %60, %cst_23 [1] : vector<8x8xf32> to vector<8xf32>
    %62 = vector.shape_cast %61 : vector<8xf32> to vector<8x1xf32>
    %63 = tpu.reciprocal %62 {approx = true} : vector<8x1xf32> -> vector<8x1xf32>
    %64 = vector.broadcast %63 : vector<8x1xf32> to vector<8x8xf32>
    %65 = arith.mulf %60, %64 : vector<8x8xf32>
    %cst_24 = arith.constant dense<0.000000e+00> : vector<8x4xf32>
    %66 = tpu.matmul %65, %52, %cst_24 {dimension_numbers = #tpu.dot_dimension_numbers<[1], [0], [0], [1], [0, 0, 1, 1], [], []>} : vector<8x8xf32>, vector<8x4xf32>, vector<8x4xf32> -> vector<8x4xf32>
    %c0_25 = arith.constant 0 : index
    %c4 = arith.constant 4 : index
    %67 = vector.load %arg14[%c0_25, %c4] : memref<8x32xf32, #tpu.memory_space<vmem>>, vector<8x4xf32>
    tpu.vector_store %arg14[%c0_25, %c4], %66 {strides = array<i32>} : memref<8x32xf32, #tpu.memory_space<vmem>>, vector<8x4xf32>,
    %68 = vector.extract_strided_slice %28 {offsets = [0, 8], sizes = [8, 4], strides = [1, 1]} : vector<8x96xf32> to vector<8x4xf32>
    %69 = vector.extract_strided_slice %28 {offsets = [0, 40], sizes = [8, 4], strides = [1, 1]} : vector<8x96xf32> to vector<8x4xf32>
    %70 = vector.extract_strided_slice %28 {offsets = [0, 72], sizes = [8, 4], strides = [1, 1]} : vector<8x96xf32> to vector<8x4xf32>
    "tpu.trace_start"() <{level = 10 : i32, message = "td,sd->ts"}> : () -> ()
    %cst_26 = arith.constant dense<0.000000e+00> : vector<8x8xf32>
    %71 = tpu.matmul %68, %69, %cst_26 {dimension_numbers = #tpu.dot_dimension_numbers<[1], [1], [0], [0], [0, 0, 1, 0], [], []>} : vector<8x4xf32>, vector<8x4xf32>, vector<8x8xf32> -> vector<8x8xf32>
    %cst_27 = arith.constant -1.000000e+30 : f32
    "tpu.trace_stop"() : () -> ()
    %72 = vector.broadcast %cst_27 : f32 to vector<8x8xf32>
    %73 = arith.select %31, %71, %72 : vector<8x8xi1>, vector<8x8xf32>
    %cst_28 = arith.constant dense<0xFF800000> : vector<8xf32>
    %74 = vector.multi_reduction <maximumf>, %73, %cst_28 [1] : vector<8x8xf32> to vector<8xf32>
    %75 = vector.shape_cast %74 : vector<8xf32> to vector<8x1xf32>
    %76 = vector.broadcast %75 : vector<8x1xf32> to vector<8x8xf32>
    %77 = arith.subf %73, %76 : vector<8x8xf32>
    %78 = math.exp %77 : vector<8x8xf32>
    %cst_29 = arith.constant dense<0.000000e+00> : vector<8xf32>
    %79 = vector.multi_reduction <add>, %78, %cst_29 [1] : vector<8x8xf32> to vector<8xf32>
    %80 = vector.shape_cast %79 : vector<8xf32> to vector<8x1xf32>
    %81 = tpu.reciprocal %80 {approx = true} : vector<8x1xf32> -> vector<8x1xf32>
    %82 = vector.broadcast %81 : vector<8x1xf32> to vector<8x8xf32>
    %83 = arith.mulf %78, %82 : vector<8x8xf32>
    %cst_30 = arith.constant dense<0.000000e+00> : vector<8x4xf32>
    %84 = tpu.matmul %83, %70, %cst_30 {dimension_numbers = #tpu.dot_dimension_numbers<[1], [0], [0], [1], [0, 0, 1, 1], [], []>} : vector<8x8xf32>, vector<8x4xf32>, vector<8x4xf32> -> vector<8x4xf32>
    %c0_31 = arith.constant 0 : index
    %c8 = arith.constant 8 : index
    %85 = vector.load %arg14[%c0_31, %c8] : memref<8x32xf32, #tpu.memory_space<vmem>>, vector<8x4xf32>
    tpu.vector_store %arg14[%c0_31, %c8], %84 {strides = array<i32>} : memref<8x32xf32, #tpu.memory_space<vmem>>, vector<8x4xf32>,
    %86 = vector.extract_strided_slice %28 {offsets = [0, 12], sizes = [8, 4], strides = [1, 1]} : vector<8x96xf32> to vector<8x4xf32>
    %87 = vector.extract_strided_slice %28 {offsets = [0, 44], sizes = [8, 4], strides = [1, 1]} : vector<8x96xf32> to vector<8x4xf32>
    %88 = vector.extract_strided_slice %28 {offsets = [0, 76], sizes = [8, 4], strides = [1, 1]} : vector<8x96xf32> to vector<8x4xf32>
    "tpu.trace_start"() <{level = 10 : i32, message = "td,sd->ts"}> : () -> ()
    %cst_32 = arith.constant dense<0.000000e+00> : vector<8x8xf32>
    %89 = tpu.matmul %86, %87, %cst_32 {dimension_numbers = #tpu.dot_dimension_numbers<[1], [1], [0], [0], [0, 0, 1, 0], [], []>} : vector<8x4xf32>, vector<8x4xf32>, vector<8x8xf32> -> vector<8x8xf32>
    %cst_33 = arith.constant -1.000000e+30 : f32
    "tpu.trace_stop"() : () -> ()
    %90 = vector.broadcast %cst_33 : f32 to vector<8x8xf32>
    %91 = arith.select %31, %89, %90 : vector<8x8xi1>, vector<8x8xf32>
    %cst_34 = arith.constant dense<0xFF800000> : vector<8xf32>
    %92 = vector.multi_reduction <maximumf>, %91, %cst_34 [1] : vector<8x8xf32> to vector<8xf32>
    %93 = vector.shape_cast %92 : vector<8xf32> to vector<8x1xf32>
    %94 = vector.broadcast %93 : vector<8x1xf32> to vector<8x8xf32>
    %95 = arith.subf %91, %94 : vector<8x8xf32>
    %96 = math.exp %95 : vector<8x8xf32>
    %cst_35 = arith.constant dense<0.000000e+00> : vector<8xf32>
    %97 = vector.multi_reduction <add>, %96, %cst_35 [1] : vector<8x8xf32> to vector<8xf32>
    %98 = vector.shape_cast %97 : vector<8xf32> to vector<8x1xf32>
    %99 = tpu.reciprocal %98 {approx = true} : vector<8x1xf32> -> vector<8x1xf32>
    %100 = vector.broadcast %99 : vector<8x1xf32> to vector<8x8xf32>
    %101 = arith.mulf %96, %100 : vector<8x8xf32>
    %cst_36 = arith.constant dense<0.000000e+00> : vector<8x4xf32>
    %102 = tpu.matmul %101, %88, %cst_36 {dimension_numbers = #tpu.dot_dimension_numbers<[1], [0], [0], [1], [0, 0, 1, 1], [], []>} : vector<8x8xf32>, vector<8x4xf32>, vector<8x4xf32> -> vector<8x4xf32>
    %c0_37 = arith.constant 0 : index
    %c12 = arith.constant 12 : index
    %103 = vector.load %arg14[%c0_37, %c12] : memref<8x32xf32, #tpu.memory_space<vmem>>, vector<8x4xf32>
    tpu.vector_store %arg14[%c0_37, %c12], %102 {strides = array<i32>} : memref<8x32xf32, #tpu.memory_space<vmem>>, vector<8x4xf32>,
    %104 = vector.extract_strided_slice %28 {offsets = [0, 16], sizes = [8, 4], strides = [1, 1]} : vector<8x96xf32> to vector<8x4xf32>
    %105 = vector.extract_strided_slice %28 {offsets = [0, 48], sizes = [8, 4], strides = [1, 1]} : vector<8x96xf32> to vector<8x4xf32>
    %106 = vector.extract_strided_slice %28 {offsets = [0, 80], sizes = [8, 4], strides = [1, 1]} : vector<8x96xf32> to vector<8x4xf32>
    "tpu.trace_start"() <{level = 10 : i32, message = "td,sd->ts"}> : () -> ()
    %cst_38 = arith.constant dense<0.000000e+00> : vector<8x8xf32>
    %107 = tpu.matmul %104, %105, %cst_38 {dimension_numbers = #tpu.dot_dimension_numbers<[1], [1], [0], [0], [0, 0, 1, 0], [], []>} : vector<8x4xf32>, vector<8x4xf32>, vector<8x8xf32> -> vector<8x8xf32>
    %cst_39 = arith.constant -1.000000e+30 : f32
    "tpu.trace_stop"() : () -> ()
    %108 = vector.broadcast %cst_39 : f32 to vector<8x8xf32>
    %109 = arith.select %31, %107, %108 : vector<8x8xi1>, vector<8x8xf32>
    %cst_40 = arith.constant dense<0xFF800000> : vector<8xf32>
    %110 = vector.multi_reduction <maximumf>, %109, %cst_40 [1] : vector<8x8xf32> to vector<8xf32>
    %111 = vector.shape_cast %110 : vector<8xf32> to vector<8x1xf32>
    %112 = vector.broadcast %111 : vector<8x1xf32> to vector<8x8xf32>
    %113 = arith.subf %109, %112 : vector<8x8xf32>
    %114 = math.exp %113 : vector<8x8xf32>
    %cst_41 = arith.constant dense<0.000000e+00> : vector<8xf32>
    %115 = vector.multi_reduction <add>, %114, %cst_41 [1] : vector<8x8xf32> to vector<8xf32>
    %116 = vector.shape_cast %115 : vector<8xf32> to vector<8x1xf32>
    %117 = tpu.reciprocal %116 {approx = true} : vector<8x1xf32> -> vector<8x1xf32>
    %118 = vector.broadcast %117 : vector<8x1xf32> to vector<8x8xf32>
    %119 = arith.mulf %114, %118 : vector<8x8xf32>
    %cst_42 = arith.constant dense<0.000000e+00> : vector<8x4xf32>
    %120 = tpu.matmul %119, %106, %cst_42 {dimension_numbers = #tpu.dot_dimension_numbers<[1], [0], [0], [1], [0, 0, 1, 1], [], []>} : vector<8x8xf32>, vector<8x4xf32>, vector<8x4xf32> -> vector<8x4xf32>
    %c0_43 = arith.constant 0 : index
    %c16 = arith.constant 16 : index
    %121 = vector.load %arg14[%c0_43, %c16] : memref<8x32xf32, #tpu.memory_space<vmem>>, vector<8x4xf32>
    tpu.vector_store %arg14[%c0_43, %c16], %120 {strides = array<i32>} : memref<8x32xf32, #tpu.memory_space<vmem>>, vector<8x4xf32>,
    %122 = vector.extract_strided_slice %28 {offsets = [0, 20], sizes = [8, 4], strides = [1, 1]} : vector<8x96xf32> to vector<8x4xf32>
    %123 = vector.extract_strided_slice %28 {offsets = [0, 52], sizes = [8, 4], strides = [1, 1]} : vector<8x96xf32> to vector<8x4xf32>
    %124 = vector.extract_strided_slice %28 {offsets = [0, 84], sizes = [8, 4], strides = [1, 1]} : vector<8x96xf32> to vector<8x4xf32>
    "tpu.trace_start"() <{level = 10 : i32, message = "td,sd->ts"}> : () -> ()
    %cst_44 = arith.constant dense<0.000000e+00> : vector<8x8xf32>
    %125 = tpu.matmul %122, %123, %cst_44 {dimension_numbers = #tpu.dot_dimension_numbers<[1], [1], [0], [0], [0, 0, 1, 0], [], []>} : vector<8x4xf32>, vector<8x4xf32>, vector<8x8xf32> -> vector<8x8xf32>
    %cst_45 = arith.constant -1.000000e+30 : f32
    "tpu.trace_stop"() : () -> ()
    %126 = vector.broadcast %cst_45 : f32 to vector<8x8xf32>
    %127 = arith.select %31, %125, %126 : vector<8x8xi1>, vector<8x8xf32>
    %cst_46 = arith.constant dense<0xFF800000> : vector<8xf32>
    %128 = vector.multi_reduction <maximumf>, %127, %cst_46 [1] : vector<8x8xf32> to vector<8xf32>
    %129 = vector.shape_cast %128 : vector<8xf32> to vector<8x1xf32>
    %130 = vector.broadcast %129 : vector<8x1xf32> to vector<8x8xf32>
    %131 = arith.subf %127, %130 : vector<8x8xf32>
    %132 = math.exp %131 : vector<8x8xf32>
    %cst_47 = arith.constant dense<0.000000e+00> : vector<8xf32>
    %133 = vector.multi_reduction <add>, %132, %cst_47 [1] : vector<8x8xf32> to vector<8xf32>
    %134 = vector.shape_cast %133 : vector<8xf32> to vector<8x1xf32>
    %135 = tpu.reciprocal %134 {approx = true} : vector<8x1xf32> -> vector<8x1xf32>
    %136 = vector.broadcast %135 : vector<8x1xf32> to vector<8x8xf32>
    %137 = arith.mulf %132, %136 : vector<8x8xf32>
    %cst_48 = arith.constant dense<0.000000e+00> : vector<8x4xf32>
    %138 = tpu.matmul %137, %124, %cst_48 {dimension_numbers = #tpu.dot_dimension_numbers<[1], [0], [0], [1], [0, 0, 1, 1], [], []>} : vector<8x8xf32>, vector<8x4xf32>, vector<8x4xf32> -> vector<8x4xf32>
    %c0_49 = arith.constant 0 : index
    %c20 = arith.constant 20 : index
    %139 = vector.load %arg14[%c0_49, %c20] : memref<8x32xf32, #tpu.memory_space<vmem>>, vector<8x4xf32>
    tpu.vector_store %arg14[%c0_49, %c20], %138 {strides = array<i32>} : memref<8x32xf32, #tpu.memory_space<vmem>>, vector<8x4xf32>,
    %140 = vector.extract_strided_slice %28 {offsets = [0, 24], sizes = [8, 4], strides = [1, 1]} : vector<8x96xf32> to vector<8x4xf32>
    %141 = vector.extract_strided_slice %28 {offsets = [0, 56], sizes = [8, 4], strides = [1, 1]} : vector<8x96xf32> to vector<8x4xf32>
    %142 = vector.extract_strided_slice %28 {offsets = [0, 88], sizes = [8, 4], strides = [1, 1]} : vector<8x96xf32> to vector<8x4xf32>
    "tpu.trace_start"() <{level = 10 : i32, message = "td,sd->ts"}> : () -> ()
    %cst_50 = arith.constant dense<0.000000e+00> : vector<8x8xf32>
    %143 = tpu.matmul %140, %141, %cst_50 {dimension_numbers = #tpu.dot_dimension_numbers<[1], [1], [0], [0], [0, 0, 1, 0], [], []>} : vector<8x4xf32>, vector<8x4xf32>, vector<8x8xf32> -> vector<8x8xf32>
    %cst_51 = arith.constant -1.000000e+30 : f32
    "tpu.trace_stop"() : () -> ()
    %144 = vector.broadcast %cst_51 : f32 to vector<8x8xf32>
    %145 = arith.select %31, %143, %144 : vector<8x8xi1>, vector<8x8xf32>
    %cst_52 = arith.constant dense<0xFF800000> : vector<8xf32>
    %146 = vector.multi_reduction <maximumf>, %145, %cst_52 [1] : vector<8x8xf32> to vector<8xf32>
    %147 = vector.shape_cast %146 : vector<8xf32> to vector<8x1xf32>
    %148 = vector.broadcast %147 : vector<8x1xf32> to vector<8x8xf32>
    %149 = arith.subf %145, %148 : vector<8x8xf32>
    %150 = math.exp %149 : vector<8x8xf32>
    %cst_53 = arith.constant dense<0.000000e+00> : vector<8xf32>
    %151 = vector.multi_reduction <add>, %150, %cst_53 [1] : vector<8x8xf32> to vector<8xf32>
    %152 = vector.shape_cast %151 : vector<8xf32> to vector<8x1xf32>
    %153 = tpu.reciprocal %152 {approx = true} : vector<8x1xf32> -> vector<8x1xf32>
    %154 = vector.broadcast %153 : vector<8x1xf32> to vector<8x8xf32>
    %155 = arith.mulf %150, %154 : vector<8x8xf32>
    %cst_54 = arith.constant dense<0.000000e+00> : vector<8x4xf32>
    %156 = tpu.matmul %155, %142, %cst_54 {dimension_numbers = #tpu.dot_dimension_numbers<[1], [0], [0], [1], [0, 0, 1, 1], [], []>} : vector<8x8xf32>, vector<8x4xf32>, vector<8x4xf32> -> vector<8x4xf32>
    %c0_55 = arith.constant 0 : index
    %c24 = arith.constant 24 : index
    %157 = vector.load %arg14[%c0_55, %c24] : memref<8x32xf32, #tpu.memory_space<vmem>>, vector<8x4xf32>
    tpu.vector_store %arg14[%c0_55, %c24], %156 {strides = array<i32>} : memref<8x32xf32, #tpu.memory_space<vmem>>, vector<8x4xf32>,
    %158 = vector.extract_strided_slice %28 {offsets = [0, 28], sizes = [8, 4], strides = [1, 1]} : vector<8x96xf32> to vector<8x4xf32>
    %159 = vector.extract_strided_slice %28 {offsets = [0, 60], sizes = [8, 4], strides = [1, 1]} : vector<8x96xf32> to vector<8x4xf32>
    %160 = vector.extract_strided_slice %28 {offsets = [0, 92], sizes = [8, 4], strides = [1, 1]} : vector<8x96xf32> to vector<8x4xf32>
    "tpu.trace_start"() <{level = 10 : i32, message = "td,sd->ts"}> : () -> ()
    %cst_56 = arith.constant dense<0.000000e+00> : vector<8x8xf32>
    %161 = tpu.matmul %158, %159, %cst_56 {dimension_numbers = #tpu.dot_dimension_numbers<[1], [1], [0], [0], [0, 0, 1, 0], [], []>} : vector<8x4xf32>, vector<8x4xf32>, vector<8x8xf32> -> vector<8x8xf32>
    %cst_57 = arith.constant -1.000000e+30 : f32
    "tpu.trace_stop"() : () -> ()
    %162 = vector.broadcast %cst_57 : f32 to vector<8x8xf32>
    %163 = arith.select %31, %161, %162 : vector<8x8xi1>, vector<8x8xf32>
    %cst_58 = arith.constant dense<0xFF800000> : vector<8xf32>
    %164 = vector.multi_reduction <maximumf>, %163, %cst_58 [1] : vector<8x8xf32> to vector<8xf32>
    %165 = vector.shape_cast %164 : vector<8xf32> to vector<8x1xf32>
    %166 = vector.broadcast %165 : vector<8x1xf32> to vector<8x8xf32>
    %167 = arith.subf %163, %166 : vector<8x8xf32>
    %168 = math.exp %167 : vector<8x8xf32>
    %cst_59 = arith.constant dense<0.000000e+00> : vector<8xf32>
    %169 = vector.multi_reduction <add>, %168, %cst_59 [1] : vector<8x8xf32> to vector<8xf32>
    %170 = vector.shape_cast %169 : vector<8xf32> to vector<8x1xf32>
    %171 = tpu.reciprocal %170 {approx = true} : vector<8x1xf32> -> vector<8x1xf32>
    %172 = vector.broadcast %171 : vector<8x1xf32> to vector<8x8xf32>
    %173 = arith.mulf %168, %172 : vector<8x8xf32>
    %cst_60 = arith.constant dense<0.000000e+00> : vector<8x4xf32>
    %174 = tpu.matmul %173, %160, %cst_60 {dimension_numbers = #tpu.dot_dimension_numbers<[1], [0], [0], [1], [0, 0, 1, 1], [], []>} : vector<8x8xf32>, vector<8x4xf32>, vector<8x4xf32> -> vector<8x4xf32>
    %c0_61 = arith.constant 0 : index
    %c28 = arith.constant 28 : index
    %175 = vector.load %arg14[%c0_61, %c28] : memref<8x32xf32, #tpu.memory_space<vmem>>, vector<8x4xf32>
    tpu.vector_store %arg14[%c0_61, %c28], %174 {strides = array<i32>} : memref<8x32xf32, #tpu.memory_space<vmem>>, vector<8x4xf32>,
    %c0_62 = arith.constant 0 : index
    %c0_63 = arith.constant 0 : index
    %176 = vector.load %arg14[%c0_62, %c0_63] : memref<8x32xf32, #tpu.memory_space<vmem>>, vector<8x32xf32>
    %177 = arith.truncf %176 : vector<8x32xf32> to vector<8x32xbf16>
    %c0_64 = arith.constant 0 : index
    %c0_65 = arith.constant 0 : index
    %178 = vector.load %arg5[%c0_64, %c0_65] : memref<32x32xbf16, #tpu.memory_space<vmem>>, vector<32x32xbf16>
    %cst_66 = arith.constant dense<0.000000e+00> : vector<8x32xf32>
    %179 = tpu.matmul %177, %178, %cst_66 {dimension_numbers = #tpu.dot_dimension_numbers<[1], [0], [0], [1], [0, 0, 1, 1], [], []>} : vector<8x32xbf16>, vector<32x32xbf16>, vector<8x32xf32> -> vector<8x32xf32>
    %c0_67 = arith.constant 0 : index
    %c0_68 = arith.constant 0 : index
    %180 = vector.load %arg6[%c0_67, %c0_68] : memref<1x32xf32, #tpu.memory_space<vmem>>, vector<1x32xf32>
    %181 = vector.broadcast %180 : vector<1x32xf32> to vector<8x32xf32>
    %182 = arith.addf %179, %181 : vector<8x32xf32>
    %183 = arith.addf %1, %182 : vector<8x32xf32>
    %c0_69 = arith.constant 0 : index
    %c0_70 = arith.constant 0 : index
    %184 = vector.load %arg7[%c0_69, %c0_70] : memref<1x32xf32, #tpu.memory_space<vmem>>, vector<1x32xf32>
    %c0_71 = arith.constant 0 : index
    %c0_72 = arith.constant 0 : index
    %185 = vector.load %arg8[%c0_71, %c0_72] : memref<1x32xf32, #tpu.memory_space<vmem>>, vector<1x32xf32>
    %cst_73 = arith.constant dense<0.000000e+00> : vector<8xf32>
    %186 = vector.multi_reduction <add>, %183, %cst_73 [1] : vector<8x32xf32> to vector<8xf32>
    %187 = vector.shape_cast %186 : vector<8xf32> to vector<8x1xf32>
    %cst_74 = arith.constant 3.200000e+01 : f32
    %188 = vector.broadcast %cst_74 : f32 to vector<8x1xf32>
    %189 = arith.divf %187, %188 : vector<8x1xf32>
    %190 = vector.broadcast %189 : vector<8x1xf32> to vector<8x32xf32>
    %191 = arith.subf %183, %190 : vector<8x32xf32>
    %192 = arith.mulf %191, %191 : vector<8x32xf32>
    %cst_75 = arith.constant dense<0.000000e+00> : vector<8xf32>
    %193 = vector.multi_reduction <add>, %192, %cst_75 [1] : vector<8x32xf32> to vector<8xf32>
    %194 = vector.shape_cast %193 : vector<8xf32> to vector<8x1xf32>
    %cst_76 = arith.constant 3.200000e+01 : f32
    %195 = vector.broadcast %cst_76 : f32 to vector<8x1xf32>
    %196 = arith.divf %194, %195 : vector<8x1xf32>
    %197 = vector.broadcast %189 : vector<8x1xf32> to vector<8x32xf32>
    %198 = arith.subf %183, %197 : vector<8x32xf32>
    %cst_77 = arith.constant 9.99999974E-6 : f32
    %199 = vector.broadcast %cst_77 : f32 to vector<8x1xf32>
    %200 = arith.addf %196, %199 : vector<8x1xf32>
    %201 = math.rsqrt %200 : vector<8x1xf32>
    %202 = vector.broadcast %201 : vector<8x1xf32> to vector<8x32xf32>
    %203 = arith.mulf %198, %202 : vector<8x32xf32>
    %204 = vector.broadcast %184 : vector<1x32xf32> to vector<8x32xf32>
    %205 = arith.mulf %203, %204 : vector<8x32xf32>
    %206 = vector.broadcast %185 : vector<1x32xf32> to vector<8x32xf32>
    %207 = arith.addf %205, %206 : vector<8x32xf32>
    %208 = arith.truncf %207 : vector<8x32xf32> to vector<8x32xbf16>
    %c0_78 = arith.constant 0 : index
    %c0_79 = arith.constant 0 : index
    %209 = vector.load %arg9[%c0_78, %c0_79] : memref<32x128xbf16, #tpu.memory_space<vmem>>, vector<32x128xbf16>
    %cst_80 = arith.constant dense<0.000000e+00> : vector<8x128xf32>
    %210 = tpu.matmul %208, %209, %cst_80 {dimension_numbers = #tpu.dot_dimension_numbers<[1], [0], [0], [1], [0, 0, 1, 1], [], []>} : vector<8x32xbf16>, vector<32x128xbf16>, vector<8x128xf32> -> vector<8x128xf32>
    %c0_81 = arith.constant 0 : index
    %c0_82 = arith.constant 0 : index
    %211 = vector.load %arg10[%c0_81, %c0_82] : memref<1x128xf32, #tpu.memory_space<vmem>>, vector<1x128xf32>
    %212 = vector.broadcast %211 : vector<1x128xf32> to vector<8x128xf32>
    %213 = arith.addf %210, %212 : vector<8x128xf32>
    %cst_83 = arith.constant 0.000000e+00 : f32
    %214 = vector.broadcast %cst_83 : f32 to vector<8x128xf32>
    %215 = arith.maximumf %213, %214 : vector<8x128xf32>
    %216 = arith.truncf %215 : vector<8x128xf32> to vector<8x128xbf16>
    %c0_84 = arith.constant 0 : index
    %c0_85 = arith.constant 0 : index
    %217 = vector.load %arg11[%c0_84, %c0_85] : memref<128x32xbf16, #tpu.memory_space<vmem>>, vector<128x32xbf16>
    %cst_86 = arith.constant dense<0.000000e+00> : vector<8x32xf32>
    %218 = tpu.matmul %216, %217, %cst_86 {dimension_numbers = #tpu.dot_dimension_numbers<[1], [0], [0], [1], [0, 0, 1, 1], [], []>} : vector<8x128xbf16>, vector<128x32xbf16>, vector<8x32xf32> -> vector<8x32xf32>
    %c0_87 = arith.constant 0 : index
    %c0_88 = arith.constant 0 : index
    %219 = vector.load %arg12[%c0_87, %c0_88] : memref<1x32xf32, #tpu.memory_space<vmem>>, vector<1x32xf32>
    %220 = vector.broadcast %219 : vector<1x32xf32> to vector<8x32xf32>
    %221 = arith.addf %218, %220 : vector<8x32xf32>
    %222 = arith.addf %183, %221 : vector<8x32xf32>
    %223 = vector.shape_cast %222 : vector<8x32xf32> to vector<1x8x32xf32>
    %c0_89 = arith.constant 0 : index
    %c0_90 = arith.constant 0 : index
    %c0_91 = arith.constant 0 : index
    %224 = vector.load %arg13[%c0_89, %c0_90, %c0_91] : memref<1x8x32xf32, #tpu.memory_space<vmem>>, vector<1x8x32xf32>
    tpu.vector_store %arg13[%c0_89, %c0_90, %c0_91], %223 {strides = array<i32>} : memref<1x8x32xf32, #tpu.memory_space<vmem>>, vector<1x8x32xf32>,
    return
  }
  func.func @transform_0(%arg0: i32) -> (i32, i32, i32) {
    %c0_i32 = arith.constant 0 : i32
    %c0_i32_0 = arith.constant 0 : i32
    %c0_i32_1 = arith.constant 0 : i32
    return %arg0, %c0_i32, %c0_i32_0 : i32, i32, i32
  }
  func.func @transform_1(%arg0: i32) -> (i32, i32) {
    %c0_i32 = arith.constant 0 : i32
    %c0_i32_0 = arith.constant 0 : i32
    %c0_i32_1 = arith.constant 0 : i32
    return %c0_i32, %c0_i32_0 : i32, i32
  }
  func.func @transform_2(%arg0: i32) -> (i32, i32) {
    %c0_i32 = arith.constant 0 : i32
    %c0_i32_0 = arith.constant 0 : i32
    %c0_i32_1 = arith.constant 0 : i32
    return %c0_i32, %c0_i32_0 : i32, i32
  }
  func.func @transform_3(%arg0: i32) -> (i32, i32) {
    %c0_i32 = arith.constant 0 : i32
    %c0_i32_0 = arith.constant 0 : i32
    %c0_i32_1 = arith.constant 0 : i32
    return %c0_i32, %c0_i32_0 : i32, i32
  }
  func.func @transform_4(%arg0: i32) -> (i32, i32) {
    %c0_i32 = arith.constant 0 : i32
    %c0_i32_0 = arith.constant 0 : i32
    %c0_i32_1 = arith.constant 0 : i32
    return %c0_i32, %c0_i32_0 : i32, i32
  }
  func.func @transform_5(%arg0: i32) -> (i32, i32) {
    %c0_i32 = arith.constant 0 : i32
    %c0_i32_0 = arith.constant 0 : i32
    %c0_i32_1 = arith.constant 0 : i32
    return %c0_i32, %c0_i32_0 : i32, i32
  }
  func.func @transform_6(%arg0: i32) -> (i32, i32) {
    %c0_i32 = arith.constant 0 : i32
    %c0_i32_0 = arith.constant 0 : i32
    %c0_i32_1 = arith.constant 0 : i32
    return %c0_i32, %c0_i32_0 : i32, i32
  }
  func.func @transform_7(%arg0: i32) -> (i32, i32) {
    %c0_i32 = arith.constant 0 : i32
    %c0_i32_0 = arith.constant 0 : i32
    %c0_i32_1 = arith.constant 0 : i32
    return %c0_i32, %c0_i32_0 : i32, i32
  }
  func.func @transform_8(%arg0: i32) -> (i32, i32) {
    %c0_i32 = arith.constant 0 : i32
    %c0_i32_0 = arith.constant 0 : i32
    %c0_i32_1 = arith.constant 0 : i32
    return %c0_i32, %c0_i32_0 : i32, i32
  }
  func.func @transform_9(%arg0: i32) -> (i32, i32) {
    %c0_i32 = arith.constant 0 : i32
    %c0_i32_0 = arith.constant 0 : i32
    %c0_i32_1 = arith.constant 0 : i32
    return %c0_i32, %c0_i32_0 : i32, i32
  }
  func.func @transform_10(%arg0: i32) -> (i32, i32) {
    %c0_i32 = arith.constant 0 : i32
    %c0_i32_0 = arith.constant 0 : i32
    %c0_i32_1 = arith.constant 0 : i32
    return %c0_i32, %c0_i32_0 : i32, i32
  }
  func.func @transform_11(%arg0: i32) -> (i32, i32) {
    %c0_i32 = arith.constant 0 : i32
    %c0_i32_0 = arith.constant 0 : i32
    %c0_i32_1 = arith.constant 0 : i32
    return %c0_i32, %c0_i32_0 : i32, i32
  }
  func.func @transform_12(%arg0: i32) -> (i32, i32, i32) {
    %c0_i32 = arith.constant 0 : i32
    %c0_i32_0 = arith.constant 0 : i32
    %c0_i32_1 = arith.constant 0 : i32
    return %arg0, %c0_i32, %c0_i32_0 : i32, i32, i32
  }
}

</mosaic_0001>

<bundles_post_ra>
// kernel: tpu_custom_call.1
= control target key start
LH: loop header
LB: loop body
LE: loop exit
PB: predicated region body
PF: predicated region fallthrough
CT: control target
= control target key end

     0   :  { %s3093_s0 = inlined_call_operand.vmem [shape: f32[2,8,32], index: 0, kind: input, shape index: {}]   ;;  %s3094_s1 = inlined_call_operand.vmem [shape: f32[1,32], index: 1, kind: input, shape index: {}]   ;;  %s3095_s2 = inlined_call_operand.vmem [shape: f32[1,32], index: 2, kind: input, shape index: {}]   ;;  %s3096_s3 = inlined_call_operand.vmem [shape: bf16[32,96], index: 3, kind: input, shape index: {}]   ;;  %s3097_s4 = inlined_call_operand.vmem [shape: bf16[32,32], index: 4, kind: input, shape index: {}]   ;;  %s3098_s5 = inlined_call_operand.vmem [shape: f32[1,32], index: 5, kind: input, shape index: {}]   ;;  %s3099_s6 = inlined_call_operand.vmem [shape: f32[1,32], index: 6, kind: input, shape index: {}]   ;;  %s3100_s7 = inlined_call_operand.vmem [shape: f32[1,32], index: 7, kind: input, shape index: {}]   ;;  %s3101_s8 = inlined_call_operand.vmem [shape: bf16[32,128], index: 8, kind: input, shape index: {}]   ;;  %s3102_s9 = inlined_call_operand.vmem [shape: f32[1,128], index: 9, kind: input, shape index: {}]   ;;  %s3103_s10 = inlined_call_operand.vmem [shape: bf16[128,32], index: 10, kind: input, shape index: {}]   ;;  %s3104_s11 = inlined_call_operand.vmem [shape: f32[1,32], index: 11, kind: input, shape index: {}]   ;;  %s3105_s12 = inlined_call_operand.hbm [shape: f32[2,8,32], index: 12, kind: output, shape index: {}]  }
   0x1   :  { %3106 = sst [smem:[#allocation6_spill]] %s3093_s0 }
   0x2   :  { %3107 = sst [smem:[#allocation7_spill]] %s3094_s1 }
   0x3   :  { %17 = vsyncpa [#allocation4], 0 }
   0x4   :  { %19 = vsyncpa [#allocation4 + $0x1], 0  ;;  %s2747_s21 = smov 0   ;;  %s2749_s22 = smov 0  }
   0x5   :  { %s2751_s23 = smov 0   ;;  %s2753_s24 = smov 0  }
   0x6 LB: > { %s2768_s25 = sadd.s32 4294967295, %s2647_s24   ;;  %s2232_s26 = sadd.s32 4294967294, %s2647_s24   ;;  %s2647_s24 = sphi %s2753_s24, %s3117_s24   ;;  %s2643_s23 = sphi %s2751_s23, %s3116_s23   ;;  %s2639_s22 = sphi %s2749_s22, %s3115_s22   ;;  %s2635_s21 = sphi %s2747_s21, %s3114_s21  }
   0x7   : > { %s2772_s27 = sadd.s32 1, %s2647_s24   ;;  %s289_s28 = sadd.s32 1, %s2643_s23 }
   0x8   : > { %s286_s29 = ssub.s32 %s2647_s24, %s2772_s27  ;;  %p299_p0 = scmp.ne.s32.totalorder %s2643_s23, %s2639_s22 }
   0x9   : > { %p287_p1 = scmp.eq.s32.totalorder %s286_s29, 0  ;;  %p300_p2 = scmp.eq.s32.totalorder %s2768_s25, 1 }
   0xa   : > { %p305_p3 = scmp.ne.s32.totalorder %s2639_s22, %s2635_s21  ;;  %p306_p4 = scmp.eq.s32.totalorder %s2232_s26, 1 }
   0xb   : > { %s2783_s30 = scalar_select %p287_p1, %s2643_s23, %s289_s28  }
   0xc   : > { %p2785_p5 = por %p300_p2, %p299_p0  ;;  %p2789_p6 = por %p306_p4, %p305_p3 }
   0xd   : > { %p2235_p7 = scmp.ge.s32.totalorder %s2647_s24, 1  ;;  %p364_p8 = scmp.lt.s32.totalorder %s2647_s24, 3 }
   0xf   : > { %p365_p9 = pnand %p2235_p7, %p364_p8 }
  0x10   : > { %p405_p10 = scmp.lt.s32.totalorder (!%p365_p9), %s2768_s25, 1  ;;  %vm413_vm0 = vcmask (!%p365_p9), 261120   ;;  %s3110_s0 = sld [smem:[#allocation6_spill]] (!%p365_p9)  ;;  %v2535_v7 = vld [vmem:[%s3096_s3] sm:$0xff] (!%p365_p9)   ;;  %v2649_v8 = vmov (!%p365_p9), 0.0   ;;  %vm2650_vm1 = vmmov (!%p365_p9), 0   ;;  %v502_v26 = vlaneseq (!%p365_p9) }
  0x11   : > { %368 = sbr.rel (%p365_p9) target bundleno = 3117 (0xc2d), region = 68  ;;  %2340 = vmatprep.subr.bf16.mxu0 (!%p365_p9), %v2649_v8  ;;  %2344 = vmatprep.mubr.msk.bf16.mxu0 (!%p365_p9), %vm2650_vm1, %v2649_v8  ;;  %v2536_v9 = vld [vmem:[%s3096_s3 + $0x8] sm:$0xff] (!%p365_p9)   ;;  %s3111_s1 = sld [smem:[#allocation7_spill]] (!%p365_p9)  ;;  %v2239_v16 = vld [vmem:[%s3095_s2] ss:$0 sm:$0xff] (!%p365_p9)  ;;  %vm510_vm2 = vcmask (!%p365_p9), 31744  }
  0x12   : > { %2341 = vmatpush3.bf16.msra.mxu0 (!%p365_p9), %v2535_v7  ;;  %2353 = vmatprep.subr.mxu1 (!%p365_p9), %v2649_v8  ;;  %s2652_s20 = smov (!%p365_p9), 96   ;;  %s2653_s26 = smov (!%p365_p9), 92   ;;  %v503_v27 = vshrl.u32 (!%p365_p9), %v502_v26, 7  ;;  %v505_v28 = vand.u32 (!%p365_p9), 127, %v502_v26  ;;  %vm586_vm4 = vcmask (!%p365_p9), 64512   ;;  %vm845_vm5 = vcmask (!%p365_p9), 64544  }
  0x13   : > { %2342 = vmatprep.subr.bf16.mxu0 (!%p365_p9), %v2649_v8  ;;  %2355 = vmatprep.mubr.msk.f32.mxu1 (!%p365_p9), %vm2650_vm1, %v2649_v8  ;;  %s2654_s28 = smov (!%p365_p9), 124   ;;  %s2655_s29 = smov (!%p365_p9), 88   ;;  %vm1017_vm6 = vcmask (!%p365_p9), 97344   ;;  %vm1189_vm7 = vcmask (!%p365_p9), 130144   ;;  %vm1361_vm8 = vcmask (!%p365_p9), 162944   ;;  %vm1533_vm9 = vcmask (!%p365_p9), 195744  }
  0x14   : > { %vm2842_vm3 = vcmp.le.s32.totalorder (!%p365_p9), %v505_v28, %v503_v27  ;;  %s2658_s17 = smov (!%p365_p9), 104   ;;  %s2659_s18 = smov (!%p365_p9), 100   ;;  %vm1705_vm10 = vcmask (!%p365_p9), 228544   ;;  %vm1877_vm11 = vcmask (!%p365_p9), 261344  }
  0x16   : > { %2343 = vmatpush3.bf16.msra.mxu0 (!%p365_p9), %v2536_v9 }
  0x17   : > { %2348 = vmatprep.subr.mxu0 (!%p365_p9), %v2649_v8  ;;  %v2238_v14 = vld [vmem:[%s3111_s1] ss:$0 sm:$0xff] (!%p365_p9) }
  0x18   : > { %s406_s15 = scalar_select %p405_p10, %s2768_s25, 1 }
  0x1a   : > { %s2237_s16 = sshll.u32 %s406_s15, 3  ;;  %s2656_s15 = smov 112  }
  0x1b   : > { %s408_s19 = scalar_lea.vmem %s3110_s0, %s2237_s16  ;;  %s2657_s16 = smov 108  }
  0x1c   : > { %v2800_v0 = vld [vmem:[%s408_s19] sm:$0xff]  ;;  %s2651_s19 = smov 64  }
  0x1d   : > { %v414_v1 = vsel %vm413_vm0, %v2800_v0, 0.0 }
  0x1e   : > { %415 = vadd.xlane.f32.xlu0 %v414_v1 }
  0xab   : > { %v416_v2 = vpop.xlane.xlu0 %415 }
  0xac   : > { %v418_v3 = vmul.f32 0.03125, %v416_v2 }
  0xae   : > { %v419_v4 = vsub.f32 %v2800_v0, %v418_v3 }
  0xb0   : > { %v420_v5 = vmul.f32 %v419_v4, %v419_v4 }
  0xb2   : > { %v421_v6 = vsel %vm413_vm0, %v420_v5, 0.0 }
  0xb3   : > { %422 = vadd.xlane.f32.xlu0 %v421_v6 }
 0x140   : > { %v423_v10 = vpop.xlane.xlu0 %422 }
 0x141   : > { %v424_v11 = vmul.f32 0.03125, %v423_v10 }
 0x143   : > { %v425_v12 = vadd.f32 1e-05, %v424_v11 }
 0x145   : > { %2549 = vrsqrt.f32 %v425_v12 }
 0x14f   : > { %v2550_v13 = vpop.eup %2549 }
 0x150   : > { %v427_v15 = vmul.f32 %v2550_v13, %v419_v4 }
 0x152   : > { %v434_v17 = vmul.f32 %v2238_v14, %v427_v15 }
 0x154   : > { %v441_v18 = vadd.f32 %v2239_v16, %v434_v17 }
 0x156   : > { %v442_v19 = vpack.c.bf16 %v441_v18, %v441_v18 }
 0x158   : > { %2345 = vmatmul.mubr.msk.bf16.vlgmr.msra.gmra.mrb[0].mxu0 %vm413_vm0, %v442_v19 }
 0x159   : > { %2350 = vmatprep.mubr.msk.f32.mxu0 %vm2650_vm1, %v2649_v8 }
 0x22b   : > { %v2829_v20 = vpop.f32.mrb[0].mxu0 }
 0x22c   : > { %598 = vrot.lane.b32.xlu0 %v2829_v20, %s2651_s19  ;;  %508 = vrot.lane.b32.xlu1 %v2829_v20, %s2652_s20  ;;  %v2346_v21 = vpop.f32.mrb[1].mxu0  ;;  %s2660_s19 = smov 120   ;;  %s2661_s20 = smov 84  }
 0x22d   : > { %v499_v22 = vpop.f32.mrb[2].mxu0 }
 0x22e   : > { %v2347_v23 = vpop.f32.mrb[3].mxu0 }
 0x230   : > { %677 = vrot.lane.b32.xlu0 %v2829_v20, %s2653_s26  ;;  %s2662_s26 = smov 116  }
 0x234   : > { %675 = vrot.lane.b32.xlu0 %v2829_v20, %s2654_s28  ;;  %s2663_s28 = smov 80  }
 0x29e   : > { %v599_v24 = vpop.permute.xlu0 %598  ;;  %v509_v25 = vpop.permute.xlu1 %508 }
 0x29f   : > { %2349 = vmatpush3.xpose.msk.msra.mxu0 %vm510_vm2, %v509_v25  ;;  %2354 = vmatpush3.msra.mxu1 %v599_v24 }
 0x2a0   : > { %2358 = vmatprep.subr.mxu1 %v2649_v8  ;;  %2363 = vmatprep.subr.mxu0 %v2649_v8 }
 0x2a2   : > { %2351 = vmatmul.mubr.msk.f32.vlgmr.msra.gmra.mrb[4].mxu0 %vm510_vm2, %v2829_v20  ;;  %v678_v39 = vpop.permute.xlu0 %677 }
 0x2a3   : > { %2365 = vmatprep.mubr.msk.f32.mxu0 %vm2650_vm1, %v2649_v8 }
 0x2a6   : > { %v676_v40 = vpop.permute.xlu0 %675 }
 0x375   : > { %v581_v30 = vpop.f32.mrb[4].mxu0 }
 0x376   : > { %v585_v31 = vsel %vm2842_vm3, %v581_v30, -1e+30  ;;  %v2352_v32 = vpop.f32.mrb[5].mxu0 }
 0x377   : > { %v587_v33 = vsel %vm586_vm4, %v585_v31, -inf }
 0x378   : > { %588 = vmax.xlane.f32.xlu1 %v587_v33 }
 0x389   : > { %849 = vrot.lane.b32.xlu1 %v2829_v20, %s2655_s29  ;;  %s2664_s29 = smov 76  }
 0x38d   : > { %1191 = vrot.lane.b32.xlu1 %v2829_v20, %s2656_s15  ;;  %s2665_s15 = smov 72  }
 0x391   : > { %1363 = vrot.lane.b32.xlu1 %v2829_v20, %s2657_s16  ;;  %s2666_s16 = smov 68  }
 0x395   : > { %1535 = vrot.lane.b32.xlu1 %v2829_v20, %s2658_s17  ;;  %s2667_s17 = smov 56  }
 0x399   : > { %1707 = vrot.lane.b32.xlu1 %v2829_v20, %s2659_s18  ;;  %s2668_s18 = smov 52  }
 0x405   : > { %v589_v34 = vpop.xlane.xlu1 %588 }
 0x406   : > { %v590_v35 = vsub.f32 %v585_v31, %v589_v34 }
 0x408   : > { %v591_v36 = vmul.f32 1.442695, %v590_v35 }
 0x409   : > { %v850_v47 = vpop.permute.xlu1 %849 }
 0x40a   : > { %2551 = vpow2.f32 %v591_v36 }
 0x40d   : > { %v1192_v49 = vpop.permute.xlu1 %1191 }
 0x411   : > { %v1364_v51 = vpop.permute.xlu1 %1363 }
 0x414   : > { %v2552_v37 = vpop.eup %2551 }
 0x415   : > { %v593_v38 = vsel %vm586_vm4, %v2552_v37, 0.0  ;;  %v1536_v53 = vpop.permute.xlu1 %1535 }
 0x416   : > { %594 = vadd.xlane.f32.xlu0 %v593_v38 }
 0x419   : > { %v1708_v55 = vpop.permute.xlu1 %1707 }
 0x42c   : > { %847 = vrot.lane.b32.xlu0 %v2829_v20, %s2660_s19  ;;  %s2669_s19 = smov 48  }
 0x430   : > { %1021 = vrot.lane.b32.xlu0 %v2829_v20, %s2661_s20  ;;  %s2670_s20 = smov 60  }
 0x434   : > { %1019 = vrot.lane.b32.xlu0 %v2829_v20, %s2662_s26  ;;  %s2671_s26 = smov 44  }
 0x438   : > { %1193 = vrot.lane.b32.xlu0 %v2829_v20, %s2663_s28  ;;  %s2672_s28 = smov 40  }
 0x43c   : > { %1365 = vrot.lane.b32.xlu0 %v2829_v20, %s2664_s29  ;;  %s2673_s29 = smov 36  }
 0x440   : > { %1537 = vrot.lane.b32.xlu0 %v2829_v20, %s2665_s15  ;;  %s2674_s15 = smov 4  }
 0x444   : > { %1709 = vrot.lane.b32.xlu0 %v2829_v20, %s2666_s16  ;;  %s2675_s16 = smov 8  }
 0x4a3   : > { %v595_v41 = vpop.xlane.xlu0 %594 }
 0x4a4   : > { %2553 = vrcp.f32 %v595_v41 }
 0x4a7   : > { %v848_v42 = vpop.permute.xlu0 %847 }
 0x4ab   : > { %v1022_v43 = vpop.permute.xlu0 %1021 }
 0x4ae   : > { %v2554_v44 = vpop.eup %2553 }
 0x4af   : > { %v597_v45 = vmul.f32 %v2554_v44, %v2552_v37  ;;  %v1020_v46 = vpop.permute.xlu0 %1019 }
 0x4b1   : > { %2356 = vmatmul.mubr.msk.f32.vlgmr.msra.gmra.mrb[0].mxu1 %vm586_vm4, %v597_v45 }
 0x4b2   : > { %2359 = vmatpush3.xpose.msk.msra.mxu1 %vm510_vm2, %v678_v39  ;;  %2360 = vmatprep.mubr.msk.f32.mxu1 %vm2650_vm1, %v2649_v8 }
 0x4b3   : > { %2368 = vmatprep.subr.mxu1 %v2649_v8  ;;  %v1194_v48 = vpop.permute.xlu0 %1193 }
 0x4b5   : > { %2361 = vmatmul.mubr.msk.f32.vlgmr.msra.gmra.mrb[2].mxu1 %vm510_vm2, %v676_v40 }
 0x4b6   : > { %2369 = vmatpush3.xpose.msk.msra.mxu1 %vm510_vm2, %v850_v47  ;;  %2370 = vmatprep.mubr.msk.f32.mxu1 %vm2650_vm1, %v2649_v8 }
 0x4b7   : > { %2378 = vmatprep.subr.mxu1 %v2649_v8  ;;  %v1366_v50 = vpop.permute.xlu0 %1365 }
 0x4b9   : > { %2371 = vmatmul.mubr.msk.f32.vlgmr.msra.gmra.mrb[4].mxu1 %vm510_vm2, %v848_v42 }
 0x4ba   : > { %2379 = vmatpush3.xpose.msk.msra.mxu1 %vm510_vm2, %v1022_v43  ;;  %2380 = vmatprep.mubr.msk.f32.mxu1 %vm2650_vm1, %v2649_v8 }
 0x4bb   : > { %2388 = vmatprep.subr.mxu1 %v2649_v8  ;;  %v1538_v52 = vpop.permute.xlu0 %1537 }
 0x4bd   : > { %2381 = vmatmul.mubr.msk.f32.vlgmr.msra.gmra.mrb[6].mxu1 %vm510_vm2, %v1020_v46 }
 0x4be   : > { %2389 = vmatpush3.xpose.msk.msra.mxu1 %vm510_vm2, %v1194_v48  ;;  %2390 = vmatprep.mubr.msk.f32.mxu1 %vm2650_vm1, %v2649_v8 }
 0x4bf   : > { %2398 = vmatprep.subr.mxu1 %v2649_v8  ;;  %v1710_v54 = vpop.permute.xlu0 %1709 }
 0x4c1   : > { %2391 = vmatmul.mubr.msk.f32.vlgmr.msra.gmra.mrb[8].mxu1 %vm510_vm2, %v1192_v49 }
 0x4c2   : > { %2399 = vmatpush3.xpose.msk.msra.mxu1 %vm510_vm2, %v1366_v50  ;;  %2400 = vmatprep.mubr.msk.f32.mxu1 %vm2650_vm1, %v2649_v8 }
 0x4c3   : > { %2408 = vmatprep.subr.mxu1 %v2649_v8 }
 0x4c5   : > { %2401 = vmatmul.mubr.msk.f32.vlgmr.msra.gmra.mrb[10].mxu1 %vm510_vm2, %v1364_v51 }
 0x4c6   : > { %2409 = vmatpush3.xpose.msk.msra.mxu1 %vm510_vm2, %v1538_v52  ;;  %2410 = vmatprep.mubr.msk.f32.mxu1 %vm2650_vm1, %v2649_v8 }
 0x4c7   : > { %2418 = vmatprep.subr.mxu1 %v2649_v8 }
 0x4c9   : > { %2411 = vmatmul.mubr.msk.f32.vlgmr.msra.gmra.mrb[12].mxu1 %vm510_vm2, %v1536_v53 }
 0x4ca   : > { %2419 = vmatpush3.xpose.msk.msra.mxu1 %vm510_vm2, %v1710_v54  ;;  %2420 = vmatprep.mubr.msk.f32.mxu1 %vm2650_vm1, %v2649_v8 }
 0x4cb   : > { %2444 = vmatprep.subr.bf16.mxu1 %v2649_v8 }
 0x4cd   : > { %2421 = vmatmul.mubr.msk.f32.vlgmr.msra.gmra.mrb[14].mxu1 %vm510_vm2, %v1708_v55 }
 0x4ce   : > { %2460 = vmatprep.mubr.msk.bf16.mxu1 %vm2650_vm1, %v2649_v8 }
 0x584   : > { %v670_v56 = vpop.f32.mrb[0].mxu1 }
 0x585   : > { %674 = vst.msk [vmem:[#allocation2] sm:$0xff] %vm510_vm2, %v670_v56  ;;  %v2357_v57 = vpop.f32.mrb[1].mxu1 }
 0x588   : > { %v749_v58 = vpop.f32.mrb[2].mxu1 }
 0x589   : > { %v753_v59 = vsel %vm2842_vm3, %v749_v58, -1e+30  ;;  %v2362_v60 = vpop.f32.mrb[3].mxu1 }
 0x58a   : > { %v754_v61 = vsel %vm586_vm4, %v753_v59, -inf }
 0x58b   : > { %755 = vmax.xlane.f32.xlu0 %v754_v61 }
 0x58c   : > { %v921_v62 = vpop.f32.mrb[4].mxu1 }
 0x58d   : > { %v925_v63 = vsel %vm2842_vm3, %v921_v62, -1e+30  ;;  %v2372_v1 = vpop.f32.mrb[5].mxu1 }
 0x58e   : > { %v926_v2 = vsel %vm586_vm4, %v925_v63, -inf }
 0x58f   : > { %927 = vmax.xlane.f32.xlu1 %v926_v2 }
 0x590   : > { %v1093_v3 = vpop.f32.mrb[6].mxu1 }
 0x591   : > { %v1097_v4 = vsel %vm2842_vm3, %v1093_v3, -1e+30  ;;  %v2382_v5 = vpop.f32.mrb[7].mxu1 }
 0x592   : > { %v1098_v6 = vsel %vm586_vm4, %v1097_v4, -inf }
 0x593   : > { %1099 = vmax.xlane.f32.xlu0 %v1098_v6 }
 0x594   : > { %v1265_v7 = vpop.f32.mrb[8].mxu1 }
 0x595   : > { %v1269_v9 = vsel %vm2842_vm3, %v1265_v7, -1e+30  ;;  %v2392_v10 = vpop.f32.mrb[9].mxu1 }
 0x596   : > { %v1270_v11 = vsel %vm586_vm4, %v1269_v9, -inf }
 0x597   : > { %1271 = vmax.xlane.f32.xlu0 %v1270_v11 }
 0x598   : > { %v1437_v12 = vpop.f32.mrb[10].mxu1 }
 0x599   : > { %v1441_v13 = vsel %vm2842_vm3, %v1437_v12, -1e+30  ;;  %v2402_v14 = vpop.f32.mrb[11].mxu1 }
 0x59a   : > { %v1442_v15 = vsel %vm586_vm4, %v1441_v13, -inf }
 0x59b   : > { %1443 = vmax.xlane.f32.xlu0 %v1442_v15 }
 0x59c   : > { %v1609_v16 = vpop.f32.mrb[12].mxu1 }
 0x59d   : > { %v2918_v17 = vsel %vm2842_vm3, %v1609_v16, -1e+30  ;;  %v2412_v18 = vpop.f32.mrb[13].mxu1 }
 0x59e   : > { %v1614_v19 = vsel %vm586_vm4, %v2918_v17, -inf }
 0x59f   : > { %1615 = vmax.xlane.f32.xlu1 %v1614_v19 }
 0x5a0   : > { %v1781_v21 = vpop.f32.mrb[14].mxu1 }
 0x5a1   : > { %v1785_v22 = vsel %vm2842_vm3, %v1781_v21, -1e+30  ;;  %v2422_v23 = vpop.f32.mrb[15].mxu1 }
 0x5a2   : > { %v1786_v24 = vsel %vm586_vm4, %v1785_v22, -inf }
 0x5a3   : > { %1787 = vmax.xlane.f32.xlu0 %v1786_v24 }
 0x5b0   : > { %937 = vrot.lane.b32.xlu1 %v2829_v20, %s2667_s17  ;;  %s2676_s17 = smov 12  }
 0x5b4   : > { %1109 = vrot.lane.b32.xlu1 %v2829_v20, %s2668_s18  ;;  %s2677_s18 = smov 16  }
 0x5b8   : > { %1281 = vrot.lane.b32.xlu1 %v2829_v20, %s2669_s19  ;;  %s2678_s19 = smov 20  }
 0x5b9   : > { %765 = vrot.lane.b32.xlu0 %v2829_v20, %s2670_s20  ;;  %s2681_s20 = smov [#allocation3]  }
 0x618   : > { %v756_v25 = vpop.xlane.xlu0 %755 }
 0x619   : > { %v757_v26 = vsub.f32 %v753_v59, %v756_v25 }
 0x61b   : > { %v758_v27 = vmul.f32 1.442695, %v757_v26 }
 0x61c   : > { %v928_v28 = vpop.xlane.xlu1 %927 }
 0x61d   : > { %2555 = vpow2.f32 %v758_v27  ;;  %v929_v29 = vsub.f32 %v925_v63, %v928_v28 }
 0x61f   : > { %v930_v30 = vmul.f32 1.442695, %v929_v29 }
 0x620   : > { %v1100_v31 = vpop.xlane.xlu0 %1099 }
 0x621   : > { %2557 = vpow2.f32 %v930_v30  ;;  %v1101_v32 = vsub.f32 %v1097_v4, %v1100_v31 }
 0x623   : > { %v1102_v33 = vmul.f32 1.442695, %v1101_v32 }
 0x624   : > { %v1272_v34 = vpop.xlane.xlu0 %1271 }
 0x625   : > { %2559 = vpow2.f32 %v1102_v33  ;;  %v1273_v35 = vsub.f32 %v1269_v9, %v1272_v34 }
 0x627   : > { %v2556_v36 = vpop.eup %2555  ;;  %v1274_v37 = vmul.f32 1.442695, %v1273_v35 }
 0x628   : > { %v1444_v38 = vpop.xlane.xlu0 %1443  ;;  %v760_v39 = vsel %vm586_vm4, %v2556_v36, 0.0 }
 0x629   : > { %2561 = vpow2.f32 %v1274_v37  ;;  %v1445_v40 = vsub.f32 %v1441_v13, %v1444_v38  ;;  %761 = vadd.xlane.f32.xlu1 %v760_v39  ;;  %v2538_v37 = vld [vmem:[%s3097_s4 + $0x8] sm:$0xff]  }
 0x62b   : > { %v2558_v41 = vpop.eup %2557  ;;  %v1446_v42 = vmul.f32 1.442695, %v1445_v40 }
 0x62c   : > { %v932_v43 = vsel %vm586_vm4, %v2558_v41, 0.0  ;;  %v1616_v56 = vpop.xlane.xlu1 %1615 }
 0x62d   : > { %2563 = vpow2.f32 %v1446_v42  ;;  %933 = vadd.xlane.f32.xlu0 %v932_v43  ;;  %v1617_v57 = vsub.f32 %v2918_v17, %v1616_v56 }
 0x62f   : > { %v2560_v44 = vpop.eup %2559  ;;  %v1618_v58 = vmul.f32 1.442695, %v1617_v57 }
 0x630   : > { %v1788_v45 = vpop.xlane.xlu0 %1787  ;;  %v1104_v46 = vsel %vm586_vm4, %v2560_v44, 0.0  ;;  %v938_v61 = vpop.permute.xlu1 %937 }
 0x631   : > { %v1789_v47 = vsub.f32 %v1785_v22, %v1788_v45  ;;  %1105 = vadd.xlane.f32.xlu1 %v1104_v46 }
 0x633   : > { %v2562_v48 = vpop.eup %2561  ;;  %v1790_v49 = vmul.f32 1.442695, %v1789_v47 }
 0x634   : > { %v766_v50 = vpop.permute.xlu0 %765  ;;  %v1276_v51 = vsel %vm586_vm4, %v2562_v48, 0.0  ;;  %v1110_v62 = vpop.permute.xlu1 %1109 }
 0x635   : > { %2565 = vpow2.f32 %v1790_v49  ;;  %2364 = vmatpush3.msra.mxu0 %v766_v50  ;;  %1277 = vadd.xlane.f32.xlu0 %v1276_v51  ;;  %v2267_v51 = vld [vmem:[%s3098_s5] ss:$0 sm:$0xff] }
 0x636   : > { %2373 = vmatprep.subr.mxu0 %v2649_v8  ;;  %2567 = vpow2.f32 %v1618_v58 }
 0x637   : > { %v2564_v52 = vpop.eup %2563 }
 0x638   : > { %v1448_v53 = vsel %vm586_vm4, %v2564_v52, 0.0  ;;  %v1282_v63 = vpop.permute.xlu1 %1281 }
 0x639   : > { %1449 = vadd.xlane.f32.xlu1 %v1448_v53 }
 0x63f   : > { %v2935_v54 = vpop.eup %2565 }
 0x640   : > { %v1792_v55 = vsel %vm586_vm4, %v2935_v54, 0.0  ;;  %v2568_v59 = vpop.eup %2567 }
 0x641   : > { %1793 = vadd.xlane.f32.xlu1 %v1792_v55  ;;  %v1620_v60 = vsel %vm586_vm4, %v2568_v59, 0.0 }
 0x64b   : > { %1453 = vrot.lane.b32.xlu0 %v2829_v20, %s2671_s26  ;;  %s2589_s26 = sshll.u32 %s2681_s20, 4  ;;  %s2590_s26 = int_to_ptr.vmem [resolvable:$false] %s2589_s26 }
 0x64c   : > { %s2591_s1 = scalar_lea.vmem %s2590_s26, 256 }
 0x652   : > { %1625 = vrot.lane.b32.xlu1 %v2829_v20, %s2672_s28  ;;  %s2287_s28 = sshll.u32 %s2768_s25, 7 }
 0x653   : > { %s3050_s0 = scalar_lea.hbm %s3105_s12, %s2287_s28 }
 0x66a   : > { %1621 = vadd.xlane.f32.xlu0 %v1620_v60 }
 0x680   : > { %1797 = vrot.lane.b32.xlu0 %v2829_v20, %s2673_s29 }
 0x6b6   : > { %v762_v1 = vpop.xlane.xlu1 %761 }
 0x6b7   : > { %2569 = vrcp.f32 %v762_v1  ;;  %v2539_v1 = vld [vmem:[%s3101_s8] sm:$0xff]  }
 0x6ba   : > { %v934_v2 = vpop.xlane.xlu0 %933 }
 0x6bb   : > { %2571 = vrcp.f32 %v934_v2  ;;  %v2541_v2 = vld [vmem:[%s3103_s10] sm:$0xff]  }
 0x6bc   : > { %2445 = vmatpush3.bf16.msra.mxu1 %v2541_v2 }
 0x6bd   : > { %2446 = vmatprep.subr.bf16.mxu1 %v2649_v8 }
 0x6be   : > { %v1106_v3 = vpop.xlane.xlu1 %1105 }
 0x6bf   : > { %2573 = vrcp.f32 %v1106_v3  ;;  %v2542_v3 = vld [vmem:[%s3103_s10 + $0x8] sm:$0xff]  }
 0x6c0   : > { %2447 = vmatpush3.bf16.msra.mxu1 %v2542_v3 }
 0x6c1   : > { %v2570_v4 = vpop.eup %2569  ;;  %2448 = vmatprep.subr.bf16.mxu1 %v2649_v8 }
 0x6c2   : > { %v764_v5 = vmul.f32 %v2570_v4, %v2556_v36  ;;  %v1278_v6 = vpop.xlane.xlu0 %1277  ;;  %v2537_v36 = vld [vmem:[%s3097_s4] sm:$0xff]   ;;  %v2543_v4 = vld [vmem:[%s3103_s10 + $0x10] sm:$0xff]  }
 0x6c3   : > { %2575 = vrcp.f32 %v1278_v6  ;;  %v2545_v6 = vld [vmem:[%s3103_s10 + $0x20] sm:$0xff]  }
 0x6c4   : > { %2366 = vmatmul.mubr.msk.f32.vlgmr.msra.gmra.mrb[6].mxu0 %vm586_vm4, %v764_v5  ;;  %2449 = vmatpush3.bf16.msra.mxu1 %v2543_v4  ;;  %v2544_v5 = vld [vmem:[%s3103_s10 + $0x18] sm:$0xff]  }
 0x6c5   : > { %v2572_v7 = vpop.eup %2571  ;;  %2374 = vmatpush3.msra.mxu0 %v938_v61  ;;  %2375 = vmatprep.mubr.msk.f32.mxu0 %vm2650_vm1, %v2649_v8 }
 0x6c6   : > { %v936_v20 = vmul.f32 %v2572_v7, %v2558_v41  ;;  %v1450_v9 = vpop.xlane.xlu1 %1449  ;;  %2383 = vmatprep.subr.mxu0 %v2649_v8  ;;  %v1454_v15 = vpop.permute.xlu0 %1453  ;;  %2450 = vmatprep.subr.bf16.mxu1 %v2649_v8  ;;  %v2546_v7 = vld [vmem:[%s3103_s10 + $0x28] sm:$0xff]  }
 0x6c7   : > { %2577 = vrcp.f32 %v1450_v9 }
 0x6c8   : > { %2376 = vmatmul.mubr.msk.f32.vlgmr.msra.gmra.mrb[8].mxu0 %vm586_vm4, %v936_v20  ;;  %2451 = vmatpush3.bf16.msra.mxu1 %v2544_v5 }
 0x6c9   : > { %v2574_v10 = vpop.eup %2573  ;;  %2384 = vmatpush3.msra.mxu0 %v1110_v62  ;;  %2385 = vmatprep.mubr.msk.f32.mxu0 %vm2650_vm1, %v2649_v8 }
 0x6ca   : > { %v1108_v11 = vmul.f32 %v2574_v10, %v2560_v44  ;;  %2393 = vmatprep.subr.mxu0 %v2649_v8  ;;  %2452 = vmatprep.subr.bf16.mxu1 %v2649_v8 }
 0x6cc   : > { %2386 = vmatmul.mubr.msk.f32.vlgmr.msra.gmra.mrb[10].mxu0 %vm586_vm4, %v1108_v11  ;;  %2453 = vmatpush3.bf16.msra.mxu1 %v2545_v6 }
 0x6cd   : > { %v2576_v12 = vpop.eup %2575  ;;  %2394 = vmatpush3.msra.mxu0 %v1282_v63  ;;  %2395 = vmatprep.mubr.msk.f32.mxu0 %vm2650_vm1, %v2649_v8 }
 0x6ce   : > { %v1280_v13 = vmul.f32 %v2576_v12, %v2562_v48  ;;  %v1794_v14 = vpop.xlane.xlu1 %1793  ;;  %2403 = vmatprep.subr.mxu0 %v2649_v8  ;;  %2454 = vmatprep.subr.bf16.mxu1 %v2649_v8  ;;  %v2271_v12 = vld [vmem:[%s3099_s6] ss:$0 sm:$0xff] }
 0x6d0   : > { %2396 = vmatmul.mubr.msk.f32.vlgmr.msra.gmra.mrb[12].mxu0 %vm586_vm4, %v1280_v13  ;;  %2455 = vmatpush3.bf16.msra.mxu1 %v2546_v7 }
 0x6d1   : > { %v2578_v16 = vpop.eup %2577  ;;  %2404 = vmatpush3.msra.mxu0 %v1454_v15  ;;  %2405 = vmatprep.mubr.msk.f32.mxu0 %vm2650_vm1, %v2649_v8 }
 0x6d2   : > { %v1452_v17 = vmul.f32 %v2578_v16, %v2564_v52  ;;  %v1626_v18 = vpop.permute.xlu1 %1625  ;;  %2413 = vmatprep.subr.mxu0 %v2649_v8  ;;  %2456 = vmatprep.subr.bf16.mxu1 %v2649_v8 }
 0x6d4   : > { %2406 = vmatmul.mubr.msk.f32.vlgmr.msra.gmra.mrb[14].mxu0 %vm586_vm4, %v1452_v17 }
 0x6d5   : > { %2414 = vmatpush3.msra.mxu0 %v1626_v18  ;;  %2415 = vmatprep.mubr.msk.f32.mxu0 %vm2650_vm1, %v2649_v8  ;;  %v2547_v18 = vld [vmem:[%s3103_s10 + $0x30] sm:$0xff]  }
 0x6d6   : > { %2423 = vmatprep.subr.mxu0 %v2649_v8  ;;  %2457 = vmatpush3.bf16.msra.mxu1 %v2547_v18 }
 0x6d7   : > { %2458 = vmatprep.subr.bf16.mxu1 %v2649_v8 }
 0x6f7   : > { %v1622_v19 = vpop.xlane.xlu0 %1621 }
 0x6f8   : > { %2579 = vrcp.f32 %v1622_v19  ;;  %v2548_v19 = vld [vmem:[%s3103_s10 + $0x38] sm:$0xff]  }
 0x6f9   : > { %2581 = vrcp.f32 %v1794_v14  ;;  %v2272_v14 = vld [vmem:[%s3100_s7] ss:$0 sm:$0xff]  ;;  %2459 = vmatpush3.bf16.msra.mxu1 %v2548_v19 }
 0x6fb   : > { %v1798_v24 = vpop.permute.xlu0 %1797 }
 0x702   : > { %v2580_v21 = vpop.eup %2579 }
 0x703   : > { %v1624_v22 = vmul.f32 %v2580_v21, %v2568_v59  ;;  %v2582_v23 = vpop.eup %2581  ;;  %v2273_v21 = vld [vmem:[%s3102_s9] ss:$0 sm:$0xff] }
 0x704   : > { %v1796_v25 = vmul.f32 %v2582_v23, %v2935_v54 }
 0x705   : > { %2416 = vmatmul.mubr.msk.f32.vlgmr.msra.gmra.mrb[16].mxu0 %vm586_vm4, %v1624_v22 }
 0x706   : > { %2424 = vmatpush3.msra.mxu0 %v1798_v24  ;;  %2425 = vmatprep.mubr.msk.f32.mxu0 %vm2650_vm1, %v2649_v8 }
 0x707   : > { %2428 = vmatprep.subr.bf16.mxu0 %v2649_v8 }
 0x709   : > { %2426 = vmatmul.mubr.msk.f32.vlgmr.msra.gmra.mrb[18].mxu0 %vm586_vm4, %v1796_v25 }
 0x70a   : > { %2432 = vmatprep.mubr.msk.bf16.mxu0 %vm2650_vm1, %v2649_v8  ;;  %2429 = vmatpush3.bf16.msra.mxu0 %v2537_v36 }
 0x70b   : > { %2430 = vmatprep.subr.bf16.mxu0 %v2649_v8 }
 0x70e   : > { %2431 = vmatpush3.bf16.msra.mxu0 %v2538_v37 }
 0x70f   : > { %2436 = vmatprep.subr.bf16.mxu0 %v2649_v8 }
 0x797   : > { %v837_v26 = vpop.f32.mrb[6].mxu0 }
 0x798   : > { %842 = vrot.lane.b32.xlu1 %v837_v26, %s2674_s15  ;;  %v2367_v27 = vpop.f32.mrb[7].mxu0  ;;  %s2679_s15 = smov 24  }
 0x79b   : > { %v1009_v28 = vpop.f32.mrb[8].mxu0 }
 0x79c   : > { %1014 = vrot.lane.b32.xlu0 %v1009_v28, %s2675_s16  ;;  %v2377_v29 = vpop.f32.mrb[9].mxu0  ;;  %s2680_s16 = smov 28  }
 0x79f   : > { %v1181_v30 = vpop.f32.mrb[10].mxu0 }
 0x7a0   : > { %1186 = vrot.lane.b32.xlu1 %v1181_v30, %s2676_s17  ;;  %v2387_v31 = vpop.f32.mrb[11].mxu0 }
 0x7a3   : > { %v1353_v32 = vpop.f32.mrb[12].mxu0 }
 0x7a4   : > { %1358 = vrot.lane.b32.xlu0 %v1353_v32, %s2677_s18  ;;  %v2397_v33 = vpop.f32.mrb[13].mxu0  ;;  %s402_s18 = sand.u32 1, %s2639_s22  }
 0x7a5   : > { %s2160_s25 = scalar_lea.sflag [#allocation4], %s402_s18 }
 0x7a7   : > { %v1525_v34 = vpop.f32.mrb[14].mxu0 }
 0x7a8   : > { %1530 = vrot.lane.b32.xlu1 %v1525_v34, %s2678_s19  ;;  %v2407_v35 = vpop.f32.mrb[15].mxu0  ;;  %s2236_s19 = sshll.u32 %s402_s18, 3 }
 0x7a9   : > { %s404_s29 = scalar_lea.vmem [#allocation3], %s2236_s19 }
 0x7d8   : > { %v1697_v38 = vpop.f32.mrb[16].mxu0 }
 0x7d9   : > { %1702 = vrot.lane.b32.xlu0 %v1697_v38, %s2679_s15  ;;  %v2417_v39 = vpop.f32.mrb[17].mxu0  ;;  %s2173_s15 = sshll.u32 %s404_s29, 4  ;;  %s3052_s15 = int_to_ptr.vmem [resolvable:$true] %s2173_s15 }
 0x7da   : > { %s2585_s19 = scalar_lea.vmem %s3052_s15, 128  ;;  %p2592_p0 = scmp.lt.s32.totalorder %s3052_s15, %s2590_s26 }
 0x7db   : > { %p2586_p11 = scmp.ne.s32.totalorder %s3052_s15, %s2585_s19  ;;  %p2593_p1 = scmp.lt.s32.totalorder %s2591_s1, %s2585_s19 }
 0x7dc   : > { %v1869_v40 = vpop.f32.mrb[18].mxu0 }
 0x7dd   : > { %1874 = vrot.lane.b32.xlu1 %v1869_v40, %s2680_s16  ;;  %v2427_v41 = vpop.f32.mrb[19].mxu0  ;;  %p2587_p12 = pnand %p2586_p11, %p2785_p5  ;;  %p2594_p2 = por %p2593_p1, %p2592_p0 }
 0x7df   : > { %p2588_p13 = pneg %p2587_p12 }
 0x7e1   : > { %p2595_p3 = pnand %p2594_p2, %p2588_p13 }
 0x80a   : > { %v843_v42 = vpop.permute.xlu1 %842 }
 0x80b   : > { %846 = vst.msk [vmem:[#allocation2] sm:$0xff] %vm845_vm5, %v843_v42 }
 0x80e   : > { %v1015_v43 = vpop.permute.xlu0 %1014 }
 0x80f   : > { %1018 = vst.msk [vmem:[#allocation2] sm:$0xff] %vm1017_vm6, %v1015_v43 }
 0x812   : > { %v1187_v44 = vpop.permute.xlu1 %1186 }
 0x813   : > { %1190 = vst.msk [vmem:[#allocation2] sm:$0xff] %vm1189_vm7, %v1187_v44 }
 0x816   : > { %v1359_v45 = vpop.permute.xlu0 %1358 }
 0x817   : > { %1362 = vst.msk [vmem:[#allocation2] sm:$0xff] %vm1361_vm8, %v1359_v45 }
 0x81a   : > { %v1531_v46 = vpop.permute.xlu1 %1530 }
 0x81b   : > { %1534 = vst.msk [vmem:[#allocation2] sm:$0xff] %vm1533_vm9, %v1531_v46 }
 0x84b   : > { %v1703_v47 = vpop.permute.xlu0 %1702 }
 0x84c   : > { %1706 = vst.msk [vmem:[#allocation2] sm:$0xff] %vm1705_vm10, %v1703_v47 }
 0x84f   : > { %v1875_v48 = vpop.permute.xlu1 %1874 }
 0x850   : > { %1878 = vst.msk [vmem:[#allocation2] sm:$0xff] %vm1877_vm11, %v1875_v48 }
 0x857   : > { %v1879_v49 = vld [vmem:[#allocation2] sm:$0xff] }
 0x858   : > { %v1880_v50 = vpack.c.bf16 %v1879_v49, %v1879_v49 }
 0x85a   : > { %2433 = vmatmul.mubr.msk.bf16.vlgmr.msra.gmra.mrb[20].mxu0 %vm413_vm0, %v1880_v50 }
 0x85b   : > { %2440 = vmatprep.mubr.msk.bf16.mxu0 %vm2650_vm1, %v2649_v8  ;;  %2437 = vmatpush3.bf16.msra.mxu0 %v2539_v1 }
 0x85c   : > { %2438 = vmatprep.subr.bf16.mxu0 %v2649_v8  ;;  %v2277_v8 = vld [vmem:[%s3104_s11] ss:$0 sm:$0xff] }
 0x92d   : > { %v1941_v52 = vpop.f32.mrb[20].mxu0 }
 0x92e   : > { %v1942_v53 = vadd.f32 %v2267_v51, %v1941_v52  ;;  %v2434_v54 = vpop.f32.mrb[21].mxu0 }
 0x92f   : > { %v1944_v55 = vpop.f32.mrb[22].mxu0 }
 0x930   : > { %v2987_v56 = vadd.f32 %v1942_v53, %v2800_v0  ;;  %v2435_v57 = vpop.f32.mrb[23].mxu0  ;;  %v2540_v0 = vld [vmem:[%s3101_s8 + $0x8] sm:$0xff]  }
 0x931   : > { %2439 = vmatpush3.bf16.msra.mxu0 %v2540_v0 }
 0x932   : > { %v1950_v58 = vsel %vm413_vm0, %v2987_v56, 0.0 }
 0x933   : > { %1951 = vadd.xlane.f32.xlu0 %v1950_v58 }
 0x9c0   : > { %v1952_v59 = vpop.xlane.xlu0 %1951 }
 0x9c1   : > { %v1953_v60 = vmul.f32 0.03125, %v1952_v59 }
 0x9c3   : > { %v1954_v61 = vsub.f32 %v2987_v56, %v1953_v60 }
 0x9c5   : > { %v1955_v62 = vmul.f32 %v1954_v61, %v1954_v61 }
 0x9c7   : > { %v1956_v63 = vsel %vm413_vm0, %v1955_v62, 0.0 }
 0x9c8   : > { %1957 = vadd.xlane.f32.xlu1 %v1956_v63 }
 0xa55   : > { %v1958_v20 = vpop.xlane.xlu1 %1957 }
 0xa56   : > { %v1959_v9 = vmul.f32 0.03125, %v1958_v20 }
 0xa58   : > { %v1960_v10 = vadd.f32 1e-05, %v1959_v9 }
 0xa5a   : > { %2583 = vrsqrt.f32 %v1960_v10 }
 0xa64   : > { %v2584_v11 = vpop.eup %2583 }
 0xa65   : > { %v1962_v13 = vmul.f32 %v2584_v11, %v1954_v61 }
 0xa67   : > { %v1969_v15 = vmul.f32 %v2271_v12, %v1962_v13 }
 0xa69   : > { %v1976_v16 = vadd.f32 %v2272_v14, %v1969_v15 }
 0xa6b   : > { %v1977_v17 = vpack.c.bf16 %v1976_v16, %v1976_v16 }
 0xa6d   : > { %2441 = vmatmul.mubr.msk.bf16.vlgmr.msra.gmra.mrb[24].mxu0 %vm413_vm0, %v1977_v17 }
 0xb40   : > { %v2038_v22 = vpop.f32.mrb[24].mxu0 }
 0xb41   : > { %v2039_v23 = vadd.f32 %v2273_v21, %v2038_v22  ;;  %v2442_v24 = vpop.f32.mrb[25].mxu0 }
 0xb42   : > { %v2041_v25 = vpop.f32.mrb[26].mxu0 }
 0xb43   : > { %v2044_v26 = vmax.f32 %v2039_v23, 0.0  ;;  %v2443_v27 = vpop.f32.mrb[27].mxu0 }
 0xb45   : > { %v2045_v28 = vpack.c.bf16 %v2044_v26, %v2044_v26 }
 0xb47   : > { %2461 = vmatmul.mubr.bf16.vlgmr.msra.gmra.mrb[16].mxu1 %v2045_v28 }
 0xc1a   : > { %v2151_v29 = vpop.f32.mrb[16].mxu1 }
 0xc1b   : > { %v2152_v30 = vadd.f32 %v2277_v8, %v2151_v29  ;;  %v2462_v31 = vpop.f32.mrb[17].mxu1 }
 0xc1c   : > { %v2154_v32 = vpop.f32.mrb[18].mxu1 }
 0xc1d   : > { %v2157_v33 = vadd.f32 %v2152_v30, %v2987_v56  ;;  %v2463_v34 = vpop.f32.mrb[19].mxu1 }
 0xc1f   : > { %2158 = vst.msk [vmem:[%s404_s29] sm:$0xff] %vm413_vm0, %v2157_v33 }
 0xc20   : > { %2598 = shalt.err (!%p2595_p3)
}
 0xc21   : > { %s2599_s18 = scalar_lea.hbm %s3050_s0, 128  ;;  %s2603_s16 = scalar_lea.hbm %s3105_s12, 256 }
 0xc22   : > { %p2600_p4 = scmp.ne.s32.totalorder %s3050_s0, %s2599_s18  ;;  %p2604_p9 = scmp.lt.u32.totalorder %s3050_s0, %s3105_s12 }
 0xc23   : > { %p2605_p10 = scmp.lt.u32.totalorder %s2603_s16, %s2599_s18  ;;  %p2607_p12 = scmp.lt.u32.totalorder %s2599_s18, %s3050_s0 }
 0xc24   : > { %p2601_p7 = pnand %p2600_p4, %p2785_p5 }
 0xc25   : > { %p2606_p11 = por %p2605_p10, %p2604_p9 }
 0xc26   : > { %p2602_p8 = pneg %p2601_p7 }
 0xc27   : > { %p2608_p13 = por %p2607_p12, %p2606_p11 }
 0xc29   : > { %p2609_p0 = pnand %p2608_p13, %p2602_p8 }
 0xc2b   : > { %2612 = shalt.err (!%p2609_p0)
}
 0xc2c   : > { %2464 = dma.vmem_to_hbm [thread:$0]  (%p2785_p5), %s3052_s15, 128, %s3050_s0, %s2160_s25  }
 0xc2d PF: > { %p2470_p1 = scmp.ge.s32.totalorder %s2647_s24, 2  ;;  %s2185_s1 = sand.u32 1, %s2635_s21  }
 0xc2e   : > { %s2186_s19 = scalar_lea.sflag [#allocation4], %s2185_s1 }
 0xc2f   : > { %p2467_p2 = pnand %p2470_p1, %p2789_p6 }
 0xc31   : > { %2630 = dma.done.wait (!%p2467_p2), %s2186_s19, 128  }
 0xc32   : > { %2632 = vsyncadd (!%p2467_p2), %s2186_s19, 4294967168  ;;  %p22_p3 = scmp.ge.s32.totalorder %s2772_s27, 4   ;;  %s3114_s21 = smov %s2639_s22 }
 0xc33   : > { %s3115_s22 = smov %s2643_s23  ;;  %s3116_s23 = smov %s2783_s30 }
 0xc34   : > { %s3117_s24 = smov %s2772_s27  ;;  %24 = sbr.rel (!%p22_p3) target bundleno = 6 (0x6), region = 103 }
 0xc3b   :  { %2191 = vsyncpa [#allocation4], 1 }
 0xc3c   :  { %2193 = vsyncpa [#allocation4 + $0x1], 1 }

</bundles_post_ra>
